<compile_context>
chip_gen: v6e
topology: v6e:2x2x1
jax: 0.10.0
libtpu: 0.0.40
codegen_flags: <defaults>
</compile_context>

<pallas_src>
import functools

import jax
import jax.numpy as jnp
from jax.experimental import pallas as pl
from jax.experimental.pallas import tpu as pltpu


def _round_up(x, m):
    return ((x + m - 1) // m) * m


def _t5_cross_attn_kernel(h_ref, kv_ref, wq_ref, wkv_ref, wo_ref, lnw_ref,
                          pb_ref, out_ref, k_cache, v_cache, *,
                          n_heads, d_kv, eps):
    qi = pl.program_id(1)
    x = h_ref[0]                              # (TQ, D) query tile of hidden states
    dtype = k_cache.dtype                     # compute dtype for MXU operands
    tq = x.shape[0]
    inner = n_heads * d_kv

    # ---- K/V projection: once per batch element, cached in VMEM scratch ----
    # (kv / Wkv have constant index maps over qi, so their DMA is not re-issued;
    #  this removes the redundant (Lk,D)x(D,2*inner) matmul and the two head
    #  transposes from every query tile.)
    @pl.when(qi == 0)
    def _project_kv():
        kvm = kv_ref[0]                                           # (Lk, D)
        lk = kvm.shape[0]
        kvp = jnp.dot(kvm, wkv_ref[...],
                      preferred_element_type=jnp.float32).astype(dtype)  # (Lk, 2*inner)
        k = kvp[:, :inner]
        v = kvp[:, inner:]
        k_cache[...] = jnp.transpose(k.reshape(lk, n_heads, d_kv), (1, 0, 2))
        v_cache[...] = jnp.transpose(v.reshape(lk, n_heads, d_kv), (1, 0, 2))

    # ---- T5LayerNorm (no mean subtraction, no bias), computed in f32 ----
    x_f32 = x.astype(jnp.float32)
    var = jnp.mean(x_f32 * x_f32, axis=-1, keepdims=True)
    norm_x = (x_f32 * jax.lax.rsqrt(var + eps)) * lnw_ref[0].astype(jnp.float32)
    norm_x = norm_x.astype(dtype)

    # ---- Q projection (single wide MXU matmul) ----
    q = jnp.dot(norm_x, wq_ref[...],
                preferred_element_type=jnp.float32).astype(dtype)        # (TQ, inner)
    qh = jnp.transpose(q.reshape(tq, n_heads, d_kv), (1, 0, 2))          # (H, TQ, dkv)

    # ---- Head-batched attention (no per-head Python loop) ----
    scores = jnp.einsum("hqd,hkd->hqk", qh, k_cache[...],
                        preferred_element_type=jnp.float32)              # (H, TQ, Lk)
    # pb_ref[0] has shape (1|H, 1|TQ, Lk) and broadcasts against scores.
    scores = scores + pb_ref[0].astype(jnp.float32)

    m = jnp.max(scores, axis=-1, keepdims=True)
    e = jnp.exp(scores - m)
    w = e / jnp.sum(e, axis=-1, keepdims=True)       # exact divide (parity w/ torch)

    ctx = jnp.einsum("hqk,hkd->hqd", w.astype(dtype), v_cache[...],
                     preferred_element_type=jnp.float32)                 # (H, TQ, dkv)
    ctx = jnp.transpose(ctx, (1, 0, 2)).reshape(tq, inner).astype(dtype)

    # ---- Output projection + residual ----
    y = jnp.dot(ctx, wo_ref[...], preferred_element_type=jnp.float32)    # (TQ, D)
    out_ref[0] = (x_f32 + y).astype(out_ref.dtype)


def t5_layer_cross_attention(hidden_states, kv, params, position_bias, *,
                             n_heads, d_kv, eps=1e-6, q_block=128,
                             compute_dtype=None,
                             vmem_limit_bytes=48 * 1024 * 1024):
    """Fused T5LayerCrossAttention forward (eval mode, no cache)."""
    B, Lq, D = hidden_states.shape
    _, Lk, _ = kv.shape
    inner = n_heads * d_kv
    out_dtype = hidden_states.dtype
    cdt = jnp.dtype(compute_dtype) if compute_dtype is not None else hidden_states.dtype

    # Cast weights / encoder states once in the wrapper (not per grid step).
    wq = params["wq"].astype(cdt)                                        # (D, inner)
    wkv = jnp.concatenate([params["wk"], params["wv"]], axis=1).astype(cdt)  # (D, 2*inner)
    wo = params["wo"].astype(cdt)                                        # (inner, D)
    ln_w2d = params["ln_w"].reshape(1, D)
    kv_c = kv.astype(cdt)

    # --- Query tiling with tail padding (never collapse to one huge tile) ---
    tq = min(q_block, _round_up(Lq, 8))
    tq = max(8, (tq // 8) * 8)
    Lq_pad = _round_up(Lq, tq)
    n_q_tiles = Lq_pad // tq
    h_in = hidden_states
    if Lq_pad != Lq:
        h_in = jnp.pad(hidden_states, ((0, 0), (0, Lq_pad - Lq), (0, 0)))

    # --- position_bias: accept any broadcastable (1|B, 1|H, 1|Lq, Lk) shape ---
    pb = position_bias
    pb_b, pb_h, pb_q, pb_k = pb.shape
    assert pb_b in (1, B) and pb_h in (1, n_heads) and pb_q in (1, Lq) and pb_k == Lk, \
        f"position_bias shape {pb.shape} not broadcastable to {(B, n_heads, Lq, Lk)}"
    if pb_q == Lq and Lq_pad != Lq:
        pb = jnp.pad(pb, ((0, 0), (0, 0), (0, Lq_pad - Lq), (0, 0)))
    pb_blk_q = tq if pb_q == Lq else 1
    pb_has_b = (pb_b == B)
    pb_has_q = (pb_q == Lq)

    def pb_map(b, qi):
        return (b if pb_has_b else 0, 0, qi if pb_has_q else 0, 0)

    kernel = functools.partial(_t5_cross_attn_kernel,
                               n_heads=n_heads, d_kv=d_kv, eps=float(eps))

    # Advisory cost estimate so XLA schedules neighbours around this call.
    itemsize = lambda a: a.size * a.dtype.itemsize
    flops = (2 * B * Lq_pad * D * inner                      # Q projection
             + 2 * B * Lk * D * (2 * inner)                  # fused K|V projection
             + 4 * B * n_heads * Lq_pad * Lk * d_kv          # QK^T + PV
             + 2 * B * Lq_pad * inner * D)                   # output projection
    cost = pl.CostEstimate(
        flops=int(flops),
        transcendentals=int(B * n_heads * Lq_pad * Lk),
        bytes_accessed=int(itemsize(h_in) + itemsize(kv_c) + itemsize(wq)
                           + itemsize(wkv) + itemsize(wo) + itemsize(ln_w2d)
                           + itemsize(pb)
                           + B * Lq_pad * D * jnp.dtype(out_dtype).itemsize),
    )

    out = pl.pallas_call(
        kernel,
        out_shape=jax.ShapeDtypeStruct((B, Lq_pad, D), out_dtype),
        grid_spec=pltpu.PrefetchScalarGridSpec(
            num_scalar_prefetch=0,
            grid=(B, n_q_tiles),
            in_specs=[
                pl.BlockSpec((1, tq, D), lambda b, qi: (b, qi, 0)),      # hidden q-tile
                pl.BlockSpec((1, Lk, D), lambda b, qi: (b, 0, 0)),       # encoder states
                pl.BlockSpec((D, inner), lambda b, qi: (0, 0)),          # Wq
                pl.BlockSpec((D, 2 * inner), lambda b, qi: (0, 0)),      # Wk|Wv fused
                pl.BlockSpec((inner, D), lambda b, qi: (0, 0)),          # Wo
                pl.BlockSpec((1, D), lambda b, qi: (0, 0)),              # layernorm weight
                pl.BlockSpec((1, pb_h, pb_blk_q, Lk), pb_map),           # position bias
            ],
            out_specs=pl.BlockSpec((1, tq, D), lambda b, qi: (b, qi, 0)),
            scratch_shapes=[
                pltpu.VMEM((n_heads, Lk, d_kv), cdt),   # K heads, cached per batch
                pltpu.VMEM((n_heads, Lk, d_kv), cdt),   # V heads, cached per batch
            ],
        ),
        compiler_params=pltpu.CompilerParams(
            # batch axis parallel (megacore sharding); qi must be ordered for the
            # pl.when(qi == 0)-guarded K/V cache fill.
            dimension_semantics=("parallel", "arbitrary"),
            vmem_limit_bytes=vmem_limit_bytes,
        ),
        cost_estimate=cost,
    )(h_in, kv_c, wq, wkv, wo, ln_w2d, pb)

    if Lq_pad != Lq:
        out = out[:, :Lq, :]
    return out


def _reference(hidden_states, kv, params, position_bias, *, n_heads, d_kv, eps=1e-6):
    """Pure-JAX reference mirroring the PyTorch module (eval mode)."""
    hp = jax.lax.Precision.HIGHEST
    x = hidden_states.astype(jnp.float32)
    var = jnp.mean(x * x, axis=-1, keepdims=True)
    norm_x = params["ln_w"] * (x / jnp.sqrt(var + eps))

    B, Lq, D = hidden_states.shape
    Lk = kv.shape[1]
    q = jnp.dot(norm_x, params["wq"], precision=hp)
    k = jnp.dot(kv, params["wk"], precision=hp)
    v = jnp.dot(kv, params["wv"], precision=hp)

    def heads(t, L):
        return t.reshape(B, L, n_heads, d_kv).transpose(0, 2, 1, 3)

    qh, kh, vh = heads(q, Lq), heads(k, Lk), heads(v, Lk)
    scores = jnp.einsum("bnqd,bnkd->bnqk", qh, kh, precision=hp) + position_bias
    w = jax.nn.softmax(scores.astype(jnp.float32), axis=-1)
    ctx = jnp.einsum("bnqk,bnkd->bnqd", w, vh, precision=hp)
    ctx = ctx.transpose(0, 2, 1, 3).reshape(B, Lq, n_heads * d_kv)
    y = jnp.dot(ctx, params["wo"], precision=hp)
    return hidden_states + y


def _make_inputs(key, B, Lq, Lk, d_model, d_kv, n_heads, pb_shape):
    inner = n_heads * d_kv
    k_h, k_kv, k_q, k_k, k_v, k_o, k_ln, k_pb = jax.random.split(key, 8)
    hidden = jax.random.normal(k_h, (B, Lq, d_model), jnp.float32)
    kv = jax.random.normal(k_kv, (B, Lk, d_model), jnp.float32)
    # Modest weight scale keeps the softmax well conditioned so MXU bf16-pass
    # rounding of f32 matmuls stays well inside the test tolerance.
    params = {
        "wq": jax.random.normal(k_q, (d_model, inner), jnp.float32) * 0.02,
        "wk": jax.random.normal(k_k, (d_model, inner), jnp.float32) * 0.02,
        "wv": jax.random.normal(k_v, (d_model, inner), jnp.float32) * 0.02,
        "wo": jax.random.normal(k_o, (inner, d_model), jnp.float32) * 0.02,
        "ln_w": 1.0 + 0.1 * jax.random.normal(k_ln, (d_model,), jnp.float32),
    }
    pb = 0.05 * jax.random.normal(k_pb, pb_shape, jnp.float32)
    return hidden, kv, params, pb


def _check(name, key, B, Lq, Lk, d_model, d_kv, n_heads, pb_shape, q_block):
    hidden, kv, params, pb = _make_inputs(key, B, Lq, Lk, d_model, d_kv,
                                          n_heads, pb_shape)
    out = t5_layer_cross_attention(hidden, kv, params, pb,
                                   n_heads=n_heads, d_kv=d_kv, q_block=q_block)
    out = jax.block_until_ready(out)
    ref = _reference(hidden, kv, params, pb, n_heads=n_heads, d_kv=d_kv)
    assert out.shape == (B, Lq, d_model), f"{name}: bad shape {out.shape}"
    # Tolerance covers MXU multi-pass f32 matmul rounding vs the HIGHEST-precision
    # XLA reference; the kernel itself uses exact softmax division.
    assert jnp.allclose(out, ref, atol=1e-2, rtol=1e-2), f"{name}: mismatch vs reference"


if __name__ == "__main__":
    # TPU-layout-friendly config (d_model / d_kv multiples of 128 so output
    # stores are lane-dense and the fused K|V split lands on a lane tile).
    d_model, d_kv, n_heads = 256, 128, 2

    key = jax.random.PRNGKey(0)
    k1, k2, k3 = jax.random.split(key, 3)

    # 1) full (1, H, Lq, Lk) position_bias, 2 query tiles (exercises the
    #    once-per-batch K/V cache across qi).
    _check("full_bias", k1, B=2, Lq=16, Lk=32, d_model=d_model, d_kv=d_kv,
           n_heads=n_heads, pb_shape=(1, n_heads, 16, 32), q_block=8)

    # 2) Lq not a multiple of the tile (padding path) with per-batch bias.
    _check("padded_q", k2, B=2, Lq=12, Lk=32, d_model=d_model, d_kv=d_kv,
           n_heads=n_heads, pb_shape=(2, n_heads, 12, 32), q_block=8)

    # 3) mask-style (B, 1, 1, Lk) bias, broadcast in-kernel (tiny DMA per step).
    _check("mask_bias", k3, B=2, Lq=16, Lk=32, d_model=d_model, d_kv=d_kv,
           n_heads=n_heads, pb_shape=(2, 1, 1, 32), q_block=16)

    print("KERNEL_OK")
</pallas_src>

<mosaic_0001>
module attributes {stable_mosaic.version = 11 : i64} {
  func.func @_t5_cross_attn_kernel(%arg0: i32, %arg1: i32, %arg2: memref<1x8x256xf32, #tpu.memory_space<vmem>>, %arg3: memref<1x32x256xf32, #tpu.memory_space<vmem>>, %arg4: memref<256x256xf32, #tpu.memory_space<vmem>>, %arg5: memref<256x512xf32, #tpu.memory_space<vmem>>, %arg6: memref<256x256xf32, #tpu.memory_space<vmem>>, %arg7: memref<1x256xf32, #tpu.memory_space<vmem>>, %arg8: memref<1x2x8x32xf32, #tpu.memory_space<vmem>>, %arg9: memref<1x8x256xf32, #tpu.memory_space<vmem>>, %arg10: memref<2x32x128xf32, #tpu.memory_space<vmem>>, %arg11: memref<2x32x128xf32, #tpu.memory_space<vmem>>) attributes {dimension_semantics = [#tpu.dimension_semantics<parallel>, #tpu.dimension_semantics<arbitrary>], iteration_bounds = array<i64: 2, 2>, scalar_prefetch = 0 : i64, scratch_operands = 2 : i64, tpu.core_type = #tpu.core_type<tc>, window_params = [{transform_indices = @transform_0, window_bounds = array<i64: 1, 8, 256>}, {transform_indices = @transform_1, window_bounds = array<i64: 1, 32, 256>}, {pipeline_mode = #tpu.pipeline_mode<synchronous>, transform_indices = @transform_2, window_bounds = array<i64: 256, 256>}, {pipeline_mode = #tpu.pipeline_mode<synchronous>, transform_indices = @transform_3, window_bounds = array<i64: 256, 512>}, {pipeline_mode = #tpu.pipeline_mode<synchronous>, transform_indices = @transform_4, window_bounds = array<i64: 256, 256>}, {pipeline_mode = #tpu.pipeline_mode<synchronous>, transform_indices = @transform_5, window_bounds = array<i64: 1, 256>}, {transform_indices = @transform_6, window_bounds = array<i64: 1, 2, 8, 32>}, {transform_indices = @transform_7, window_bounds = array<i64: 1, 8, 256>}]} {
    %c0 = arith.constant 0 : index
    %c0_0 = arith.constant 0 : index
    %c0_1 = arith.constant 0 : index
    %0 = vector.load %arg2[%c0, %c0_0, %c0_1] : memref<1x8x256xf32, #tpu.memory_space<vmem>>, vector<1x8x256xf32>
    %1 = vector.shape_cast %0 : vector<1x8x256xf32> to vector<8x256xf32>
    %c0_i32 = arith.constant 0 : i32
    %2 = arith.cmpi eq, %arg1, %c0_i32 : i32
    %3 = arith.extui %2 : i1 to i32
    %c0_i32_2 = arith.constant 0 : i32
    %4 = arith.cmpi ne, %3, %c0_i32_2 : i32
    scf.if %4 {
      %c0_30 = arith.constant 0 : index
      %c0_31 = arith.constant 0 : index
      %c0_32 = arith.constant 0 : index
      %48 = vector.load %arg3[%c0_30, %c0_31, %c0_32] : memref<1x32x256xf32, #tpu.memory_space<vmem>>, vector<1x32x256xf32>
      %49 = vector.shape_cast %48 : vector<1x32x256xf32> to vector<32x256xf32>
      %c0_33 = arith.constant 0 : index
      %c0_34 = arith.constant 0 : index
      %50 = vector.load %arg5[%c0_33, %c0_34] : memref<256x512xf32, #tpu.memory_space<vmem>>, vector<256x512xf32>
      %cst_35 = arith.constant dense<0.000000e+00> : vector<32x512xf32>
      %51 = tpu.matmul %49, %50, %cst_35 {dimension_numbers = #tpu.dot_dimension_numbers<[1], [0], [0], [1], [0, 0, 1, 1], [], []>} : vector<32x256xf32>, vector<256x512xf32>, vector<32x512xf32> -> vector<32x512xf32>
      %52 = vector.extract_strided_slice %51 {offsets = [0, 0], sizes = [32, 256], strides = [1, 1]} : vector<32x512xf32> to vector<32x256xf32>
      %53 = vector.extract_strided_slice %51 {offsets = [0, 256], sizes = [32, 256], strides = [1, 1]} : vector<32x512xf32> to vector<32x256xf32>
      %54 = vector.shape_cast %52 : vector<32x256xf32> to vector<32x2x128xf32>
      %55 = tpu.transpose %54, [1, 0, 2] : vector<32x2x128xf32> -> vector<2x32x128xf32>
      %c0_36 = arith.constant 0 : index
      %c0_37 = arith.constant 0 : index
      %c0_38 = arith.constant 0 : index
      %56 = vector.load %arg10[%c0_36, %c0_37, %c0_38] : memref<2x32x128xf32, #tpu.memory_space<vmem>>, vector<2x32x128xf32>
      tpu.vector_store %arg10[%c0_36, %c0_37, %c0_38], %55 {strides = array<i32>} : memref<2x32x128xf32, #tpu.memory_space<vmem>>, vector<2x32x128xf32>,
      %57 = vector.shape_cast %53 : vector<32x256xf32> to vector<32x2x128xf32>
      %58 = tpu.transpose %57, [1, 0, 2] : vector<32x2x128xf32> -> vector<2x32x128xf32>
      %c0_39 = arith.constant 0 : index
      %c0_40 = arith.constant 0 : index
      %c0_41 = arith.constant 0 : index
      %59 = vector.load %arg11[%c0_39, %c0_40, %c0_41] : memref<2x32x128xf32, #tpu.memory_space<vmem>>, vector<2x32x128xf32>
      tpu.vector_store %arg11[%c0_39, %c0_40, %c0_41], %58 {strides = array<i32>} : memref<2x32x128xf32, #tpu.memory_space<vmem>>, vector<2x32x128xf32>,
    } else {
    }
    %5 = arith.mulf %1, %1 : vector<8x256xf32>
    %cst = arith.constant dense<0.000000e+00> : vector<8xf32>
    %6 = vector.multi_reduction <add>, %5, %cst [1] : vector<8x256xf32> to vector<8xf32>
    %7 = vector.shape_cast %6 : vector<8xf32> to vector<8x1xf32>
    %cst_3 = arith.constant 2.560000e+02 : f32
    %8 = vector.broadcast %cst_3 : f32 to vector<8x1xf32>
    %9 = arith.divf %7, %8 : vector<8x1xf32>
    %cst_4 = arith.constant 9.99999997E-7 : f32
    %10 = vector.broadcast %cst_4 : f32 to vector<8x1xf32>
    %11 = arith.addf %9, %10 : vector<8x1xf32>
    %12 = math.rsqrt %11 : vector<8x1xf32>
    %13 = vector.broadcast %12 : vector<8x1xf32> to vector<8x256xf32>
    %14 = arith.mulf %1, %13 : vector<8x256xf32>
    %c0_5 = arith.constant 0 : index
    %c0_6 = arith.constant 0 : index
    %15 = vector.load %arg7[%c0_5, %c0_6] : memref<1x256xf32, #tpu.memory_space<vmem>>, vector<1x256xf32>
    %16 = vector.shape_cast %15 : vector<1x256xf32> to vector<256xf32>
    %17 = vector.shape_cast %16 : vector<256xf32> to vector<1x256xf32>
    %18 = vector.broadcast %17 : vector<1x256xf32> to vector<8x256xf32>
    %19 = arith.mulf %14, %18 : vector<8x256xf32>
    %c0_7 = arith.constant 0 : index
    %c0_8 = arith.constant 0 : index
    %20 = vector.load %arg4[%c0_7, %c0_8] : memref<256x256xf32, #tpu.memory_space<vmem>>, vector<256x256xf32>
    %cst_9 = arith.constant dense<0.000000e+00> : vector<8x256xf32>
    %21 = tpu.matmul %19, %20, %cst_9 {dimension_numbers = #tpu.dot_dimension_numbers<[1], [0], [0], [1], [0, 0, 1, 1], [], []>} : vector<8x256xf32>, vector<256x256xf32>, vector<8x256xf32> -> vector<8x256xf32>
    %22 = vector.shape_cast %21 : vector<8x256xf32> to vector<8x2x128xf32>
    %23 = tpu.transpose %22, [1, 0, 2] : vector<8x2x128xf32> -> vector<2x8x128xf32>
    %c0_10 = arith.constant 0 : index
    %c0_11 = arith.constant 0 : index
    %c0_12 = arith.constant 0 : index
    %24 = vector.load %arg10[%c0_10, %c0_11, %c0_12] : memref<2x32x128xf32, #tpu.memory_space<vmem>>, vector<2x32x128xf32>
    "tpu.trace_start"() <{level = 10 : i32, message = "hqd,hkd->hqk"}> : () -> ()
    %cst_13 = arith.constant dense<0.000000e+00> : vector<2x8x32xf32>
    %25 = tpu.matmul %23, %24, %cst_13 {dimension_numbers = #tpu.dot_dimension_numbers<[2], [2], [1], [1], [0, 0, 0, 1, 1, 1], [0], [0]>} : vector<2x8x128xf32>, vector<2x32x128xf32>, vector<2x8x32xf32> -> vector<2x8x32xf32>
    "tpu.trace_stop"() : () -> ()
    %c0_14 = arith.constant 0 : index
    %c0_15 = arith.constant 0 : index
    %c0_16 = arith.constant 0 : index
    %c0_17 = arith.constant 0 : index
    %26 = vector.load %arg8[%c0_14, %c0_15, %c0_16, %c0_17] : memref<1x2x8x32xf32, #tpu.memory_space<vmem>>, vector<1x2x8x32xf32>
    %27 = vector.shape_cast %26 : vector<1x2x8x32xf32> to vector<2x8x32xf32>
    %28 = arith.addf %25, %27 : vector<2x8x32xf32>
    %cst_18 = arith.constant dense<0xFF800000> : vector<2x8xf32>
    %29 = vector.multi_reduction <maximumf>, %28, %cst_18 [2] : vector<2x8x32xf32> to vector<2x8xf32>
    %30 = vector.shape_cast %29 : vector<2x8xf32> to vector<2x8x1xf32>
    %31 = vector.broadcast %30 : vector<2x8x1xf32> to vector<2x8x32xf32>
    %32 = arith.subf %28, %31 : vector<2x8x32xf32>
    %33 = math.exp %32 : vector<2x8x32xf32>
    %cst_19 = arith.constant dense<0.000000e+00> : vector<2x8xf32>
    %34 = vector.multi_reduction <add>, %33, %cst_19 [2] : vector<2x8x32xf32> to vector<2x8xf32>
    %35 = vector.shape_cast %34 : vector<2x8xf32> to vector<2x8x1xf32>
    %36 = vector.broadcast %35 : vector<2x8x1xf32> to vector<2x8x32xf32>
    %37 = arith.divf %33, %36 : vector<2x8x32xf32>
    %c0_20 = arith.constant 0 : index
    %c0_21 = arith.constant 0 : index
    %c0_22 = arith.constant 0 : index
    %38 = vector.load %arg11[%c0_20, %c0_21, %c0_22] : memref<2x32x128xf32, #tpu.memory_space<vmem>>, vector<2x32x128xf32>
    "tpu.trace_start"() <{level = 10 : i32, message = "hqk,hkd->hqd"}> : () -> ()
    %cst_23 = arith.constant dense<0.000000e+00> : vector<2x8x128xf32>
    %39 = tpu.matmul %37, %38, %cst_23 {dimension_numbers = #tpu.dot_dimension_numbers<[2], [1], [1], [2], [0, 0, 0, 1, 1, 2], [0], [0]>} : vector<2x8x32xf32>, vector<2x32x128xf32>, vector<2x8x128xf32> -> vector<2x8x128xf32>
    "tpu.trace_stop"() : () -> ()
    %40 = tpu.transpose %39, [1, 0, 2] : vector<2x8x128xf32> -> vector<8x2x128xf32>
    %41 = vector.shape_cast %40 : vector<8x2x128xf32> to vector<8x256xf32>
    %c0_24 = arith.constant 0 : index
    %c0_25 = arith.constant 0 : index
    %42 = vector.load %arg6[%c0_24, %c0_25] : memref<256x256xf32, #tpu.memory_space<vmem>>, vector<256x256xf32>
    %cst_26 = arith.constant dense<0.000000e+00> : vector<8x256xf32>
    %43 = tpu.matmul %41, %42, %cst_26 {dimension_numbers = #tpu.dot_dimension_numbers<[1], [0], [0], [1], [0, 0, 1, 1], [], []>} : vector<8x256xf32>, vector<256x256xf32>, vector<8x256xf32> -> vector<8x256xf32>
    %44 = arith.addf %1, %43 : vector<8x256xf32>
    %c0_27 = arith.constant 0 : index
    %c0_28 = arith.constant 0 : index
    %c0_29 = arith.constant 0 : index
    %45 = vector.load %arg9[%c0_27, %c0_28, %c0_29] : memref<1x8x256xf32, #tpu.memory_space<vmem>>, vector<1x8x256xf32>
    %46 = vector.shape_cast %45 : vector<1x8x256xf32> to vector<8x256xf32>
    %47 = vector.shape_cast %44 : vector<8x256xf32> to vector<1x8x256xf32>
    tpu.vector_store %arg9[%c0_27, %c0_28, %c0_29], %47 {strides = array<i32>} : memref<1x8x256xf32, #tpu.memory_space<vmem>>, vector<1x8x256xf32>,
    return
  }
  func.func @transform_0(%arg0: i32, %arg1: i32) -> (i32, i32, i32) {
    %c0_i32 = arith.constant 0 : i32
    %c0_i32_0 = arith.constant 0 : i32
    return %arg0, %arg1, %c0_i32 : i32, i32, i32
  }
  func.func @transform_1(%arg0: i32, %arg1: i32) -> (i32, i32, i32) {
    %c0_i32 = arith.constant 0 : i32
    %c0_i32_0 = arith.constant 0 : i32
    %c0_i32_1 = arith.constant 0 : i32
    return %arg0, %c0_i32, %c0_i32_0 : i32, i32, i32
  }
  func.func @transform_2(%arg0: i32, %arg1: i32) -> (i32, i32) {
    %c0_i32 = arith.constant 0 : i32
    %c0_i32_0 = arith.constant 0 : i32
    %c0_i32_1 = arith.constant 0 : i32
    return %c0_i32, %c0_i32_0 : i32, i32
  }
  func.func @transform_3(%arg0: i32, %arg1: i32) -> (i32, i32) {
    %c0_i32 = arith.constant 0 : i32
    %c0_i32_0 = arith.constant 0 : i32
    %c0_i32_1 = arith.constant 0 : i32
    return %c0_i32, %c0_i32_0 : i32, i32
  }
  func.func @transform_4(%arg0: i32, %arg1: i32) -> (i32, i32) {
    %c0_i32 = arith.constant 0 : i32
    %c0_i32_0 = arith.constant 0 : i32
    %c0_i32_1 = arith.constant 0 : i32
    return %c0_i32, %c0_i32_0 : i32, i32
  }
  func.func @transform_5(%arg0: i32, %arg1: i32) -> (i32, i32) {
    %c0_i32 = arith.constant 0 : i32
    %c0_i32_0 = arith.constant 0 : i32
    %c0_i32_1 = arith.constant 0 : i32
    return %c0_i32, %c0_i32_0 : i32, i32
  }
  func.func @transform_6(%arg0: i32, %arg1: i32) -> (i32, i32, i32, i32) {
    %c0_i32 = arith.constant 0 : i32
    %c0_i32_0 = arith.constant 0 : i32
    %c0_i32_1 = arith.constant 0 : i32
    %c0_i32_2 = arith.constant 0 : i32
    return %c0_i32, %c0_i32_0, %arg1, %c0_i32_1 : i32, i32, i32, i32
  }
  func.func @transform_7(%arg0: i32, %arg1: i32) -> (i32, i32, i32) {
    %c0_i32 = arith.constant 0 : i32
    %c0_i32_0 = arith.constant 0 : i32
    return %arg0, %arg1, %c0_i32 : i32, i32, i32
  }
}

</mosaic_0001>

<bundles_post_ra>
// kernel: tpu_custom_call.1
= control target key start
LH: loop header
LB: loop body
LE: loop exit
PB: predicated region body
PF: predicated region fallthrough
CT: control target
= control target key end

     0   :  { %s4037_s0 = inlined_call_operand.hbm [shape: f32[2,16,256], index: 0, kind: input, shape index: {}]   ;;  %s4038_s1 = inlined_call_operand.hbm [shape: f32[2,32,256], index: 1, kind: input, shape index: {}]   ;;  %s4039_s2 = inlined_call_operand.hbm [shape: f32[256,256], index: 2, kind: input, shape index: {}]   ;;  %s4040_s3 = inlined_call_operand.hbm [shape: f32[256,512], index: 3, kind: input, shape index: {}]   ;;  %s4041_s4 = inlined_call_operand.hbm [shape: f32[256,256], index: 4, kind: input, shape index: {}]   ;;  %s4042_s5 = inlined_call_operand.vmem [shape: f32[1,256], index: 5, kind: input, shape index: {}]   ;;  %s4043_s6 = inlined_call_operand.hbm [shape: f32[1,2,16,32], index: 6, kind: input, shape index: {}]   ;;  %s4044_s7 = inlined_call_operand.hbm [shape: f32[2,16,256], index: 7, kind: output, shape index: {}]  }
   0x1   :  { %4064 = sst [smem:[#allocation34_spill]] %s4037_s0 }
   0x2   :  { %4065 = sst [smem:[#allocation35_spill]] %s4038_s1 }
   0x3   :  { %4066 = sst [smem:[#allocation36_spill]] %s4039_s2 }
   0x4   :  { %4067 = sst [smem:[#allocation37_spill]] %s4040_s3 }
   0x5   :  { %4068 = sst [smem:[#allocation38_spill]] %s4041_s4 }
   0x6   :  { %4069 = sst [smem:[#allocation39_spill]] %s4042_s5 }
   0x7   :  { %4070 = sst [smem:[#allocation40_spill]] %s4044_s7 }
   0x8   :  { %12 = vsyncpa [#allocation5], 0 }
   0x9   :  { %14 = vsyncpa [#allocation5 + $0x1], 0 }
   0xa   :  { %15 = vsyncpa [#allocation8], 0 }
   0xb   :  { %17 = vsyncpa [#allocation8 + $0x1], 0 }
   0xc   :  { %18 = vsyncpa [#allocation11], 0 }
   0xd   :  { %19 = vsyncpa [#allocation14], 0 }
   0xe   :  { %21 = vsyncpa [#allocation14 + $0x1], 0 }
   0xf   :  { %22 = vsyncpa [#allocation6], 0 }
  0x10   :  { %24 = vsyncpa [#allocation6 + $0x1], 0  ;;  %s3427_s24 = smov 0   ;;  %s3429_s25 = smov 0  }
  0x11   :  { %s3431_s26 = smov 0   ;;  %s3433_s27 = smov 0  }
  0x12   :  { %s3435_s28 = smov 0   ;;  %s3437_s29 = smov 0  }
  0x13   :  { %s3439_s30 = smov 0   ;;  %s3441_s8 = smov 0  }
  0x14   :  { %s3443_s9 = smov 0   ;;  %s3445_s10 = smov 0  }
  0x15   :  { %s3447_s11 = smov 0   ;;  %s3449_s12 = smov 0  }
  0x16   :  { %s3451_s13 = smov 0   ;;  %s3453_s14 = smov 0  }
  0x17 LB: > { %4071 = sst [smem:[#allocation22_spill]] %s3337_s30  ;;  %s3498_s15 = sadd.s32 4294967295, %s3365_s14   ;;  %s3365_s14 = sphi %s3453_s14, %s30_s14   ;;  %s3361_s13 = sphi %s3451_s13, %s4142_s13   ;;  %s3357_s12 = sphi %s3449_s12, %s4141_s12   ;;  %s3353_s11 = sphi %s3447_s11, %s4140_s11   ;;  %s3349_s10 = sphi %s3445_s10, %s4139_s10   ;;  %s3345_s9 = sphi %s3443_s9, %s4128_s9   ;;  %s3341_s8 = sphi %s3441_s8, %s4138_s8   ;;  %s3337_s30 = sphi %s3439_s30, %s4137_s30   ;;  %s3333_s29 = sphi %s3437_s29, %s4136_s29   ;;  %s3329_s28 = sphi %s3435_s28, %s4135_s28   ;;  %s3325_s27 = sphi %s3433_s27, %s4134_s27   ;;  %s3321_s26 = sphi %s3431_s26, %s4133_s26   ;;  %s3317_s25 = sphi %s3429_s25, %s4132_s25   ;;  %s3313_s24 = sphi %s3427_s24, %s4131_s24  }
  0x18   : > { %4072 = sst [smem:[#allocation23_spill]] %s3345_s9  ;;  %p2737_p0 = scmp.ge.s32.totalorder %s3365_s14, 1 }
  0x19   : > { %4073 = sst [smem:[#allocation24_spill]] %s3349_s10  ;;  %p4061_p1 = scmp.eq.s32.totalorder %s3498_s15, 0 }
  0x1a   : > { %4074 = sst [smem:[#allocation25_spill]] %s3353_s11  ;;  %p239_p2 = scmp.lt.s32.totalorder %s3365_s14, 5 }
  0x1b   : > { %s3367_s17 = smov [#allocation9]   ;;  %s3368_s20 = smov [#allocation10]  }
  0x1c   : > { %p3503_p3 = pnand %p2737_p0, %p239_p2  ;;  %s251_s18 = sshll.u32 %s3367_s17, 4  ;;  %s252_s18 = int_to_ptr.vmem [resolvable:$true] %s251_s18 }
  0x1d   : > { %s264_s21 = sshll.u32 %s3368_s20, 4  ;;  %s3054_s22 = scalar_lea.vmem %s252_s18, 8192  ;;  %s265_s21 = int_to_ptr.vmem [resolvable:$true] %s264_s21 }
  0x1e   : > { %s4075_s16 = scalar_select %p3503_p3, 1, 0 }
  0x1f   : > { %p2873_p4 = pneg %p3503_p3  ;;  %p3055_p7 = scmp.ne.s32.totalorder %s252_s18, %s3054_s22 }
  0x20   : > { %4076 = sst [smem:[#allocation26_spill]] %s4075_s16  ;;  %p3062_p10 = scmp.lt.s32.totalorder %s252_s18, %s252_s18 }
  0x21   : > { %p3511_p5 = pnand %p2873_p4, %p4061_p1  ;;  %p3063_p11 = scmp.lt.s32.totalorder %s3054_s22, %s3054_s22 }
  0x23   : > { %p3045_p6 = pneg %p3511_p5  ;;  %p3064_p12 = por %p3063_p11, %p3062_p10 }
  0x25   : > { %p3057_p8 = pnand %p3055_p7, %p3045_p6 }
  0x27   : > { %p3058_p9 = pneg %p3057_p8 }
  0x29   : > { %p3065_p13 = pnand %p3064_p12, %p3058_p9 }
  0x2b   : > { %3068 = shalt.err (!%p3065_p13)
}
  0x2c   : > { %s4047_s23 = smov 256   ;;  %s4049_s17 = smov 16  }
  0x2d   : > { %s4078_s2 = sld [smem:[#allocation36_spill]]  ;;  %s3080_s11 = scalar_lea.vmem %s265_s21, 16384 }
  0x2e   : > { %p3081_p0 = scmp.ne.s32.totalorder %s265_s21, %s3080_s11  ;;  %p3088_p7 = scmp.lt.s32.totalorder %s265_s21, %s265_s21 }
  0x2f   : > { %p3089_p8 = scmp.lt.s32.totalorder %s3080_s11, %s3080_s11 }
  0x30   : > { %p3083_p2 = pnand %p3081_p0, %p3045_p6 }
  0x31   : > { %p3090_p9 = por %p3089_p8, %p3088_p7 }
  0x32   : > { %p3084_p4 = pneg %p3083_p2 }
  0x33   : > { %2876 = dma.hbm_to_vmem [thread:$0]  (!%p3511_p5), %s4078_s2, 8192, %s252_s18, [#allocation8], %s4047_s23, %s4047_s23, %s4049_s17  }
  0x34   : > { %p3091_p10 = pnand %p3090_p9, %p3084_p4 }
  0x36   : > { %3094 = shalt.err (!%p3091_p10)
}
  0x37   : > { %s3371_s22 = smov 512   ;;  %s3372_s5 = smov 32  }
  0x38   : > { %s4079_s3 = sld [smem:[#allocation37_spill]]  ;;  %s3373_s7 = smov [#allocation12]  }
  0x39   : > { %s277_s18 = sshll.u32 %s3373_s7, 4  ;;  %s278_s18 = int_to_ptr.vmem [resolvable:$true] %s277_s18 }
  0x3a   : > { %s3106_s20 = scalar_lea.vmem %s278_s18, 8192  ;;  %p3114_p0 = scmp.lt.s32.totalorder %s278_s18, %s278_s18 }
  0x3b   : > { %p3107_p11 = scmp.ne.s32.totalorder %s278_s18, %s3106_s20  ;;  %p3115_p2 = scmp.lt.s32.totalorder %s3106_s20, %s3106_s20 }
  0x3d   : > { %p3109_p12 = pnand %p3107_p11, %p3045_p6  ;;  %p3116_p4 = por %p3115_p2, %p3114_p0 }
  0x3e   : > { %2879 = dma.hbm_to_vmem [thread:$0]  (!%p3511_p5), %s4079_s3, 16384, %s265_s21, [#allocation11], %s3371_s22, %s3371_s22, %s3372_s5  }
  0x3f   : > { %p3110_p13 = pneg %p3109_p12 }
  0x41   : > { %p3117_p7 = pnand %p3116_p4, %p3110_p13 }
  0x43   : > { %3120 = shalt.err (!%p3117_p7)
}
  0x44   : > { %s4080_s4 = sld [smem:[#allocation38_spill]]  ;;  %s39_s16 = sadd.s32 1, %s3357_s12 }
  0x45   : > { %s42_s19 = sadd.s32 1, %s3361_s13  ;;  %p40_p6 = scmp.ge.s32.totalorder %s39_s16, 2 }
  0x46   : > { %s51_s21 = sadd.s32 1, %s3345_s9  ;;  %p4051_p8 = scmp.ne.s32.totalorder %s3345_s9, %s3341_s8 }
  0x47   : > { %p59_p9 = scmp.eq.s32.totalorder %s3365_s14, 0  ;;  %s4144_s16 = smov (%p40_p6, %s39_s16), 0 }
  0x48   : > { %4081 = sst [smem:[#allocation27_spill]] %s4144_s16  ;;  %s4146_s19 = smov (!%p40_p6, %s42_s19), %s3361_s13 }
  0x49   : > { %s47_s22 = ssub.s32 %s3357_s12, %s4144_s16  ;;  %p44_p10 = scmp.ge.s32.totalorder %s4146_s19, 2 }
  0x4a   : > { %2882 = dma.hbm_to_vmem [thread:$0]  (!%p3511_p5), %s4080_s4, 8192, %s278_s18, [#allocation11], %s4047_s23, %s4047_s23, %s4049_s17  }
  0x4b   : > { %p3564_p5 = por %p59_p9, %p4051_p8  ;;  %p4050_p11 = scmp.ne.s32.totalorder %s3341_s8, %s3337_s30 }
  0x4c   : > { %s77_s18 = sadd.s32 1, %s3333_s29  ;;  %p84_p12 = scmp.ne.s32.totalorder %s3333_s29, %s3329_s28 }
  0x4d   : > { %s4148_s19 = smov (%p44_p10, %s4146_s19), 0  ;;  %p3580_p13 = por %p4061_p1, %p4050_p11 }
  0x4e   : > { %4083 = sst [smem:[#allocation28_spill]] %s4148_s19  ;;  %p3586_p0 = por %p84_p12, %p59_p9 }
  0x4f   : > { %s4084_s20 = scalar_select %p3580_p13, 1, 0 }
  0x50   : > { %s46_s10 = ssub.s32 %s3361_s13, %s4148_s19  ;;  %p90_p2 = scmp.ne.s32.totalorder %s3329_s28, %s3325_s27 }
  0x51   : > { %s48_s23 = sor.u32 %s47_s22, %s46_s10  ;;  %p75_p4 = scmp.eq.s32.totalorder %s46_s10, 0 }
  0x52   : > { %p49_p7 = scmp.eq.s32.totalorder %s48_s23, 0  ;;  %p3596_p6 = por %p90_p2, %p4061_p1 }
  0x53   : > { %s3601_s11 = scalar_select %p75_p4, %s3333_s29, %s77_s18  }
  0x54   : > { %s4086_s17 = scalar_select %p3596_p6, 1, 0 }
  0x55   : > { %4087 = sst [smem:[#allocation29_spill]] %s3601_s11  ;;  %p185_p10 = scmp.eq.s32.totalorder %s47_s22, 0 }
  0x56   : > { %s3604_s2 = scalar_select %p49_p7, %s3345_s9, %s51_s21  }
  0x57   : > { %s187_s27 = sadd.s32 1, %s3321_s26  ;;  %p194_p12 = scmp.ne.s32.totalorder %s3321_s26, %s3317_s25 }
  0x58   : > { %4088 = sst [smem:[#allocation30_spill]] %s3604_s2  ;;  %p200_p11 = scmp.ne.s32.totalorder %s3317_s25, %s3313_s24 }
  0x59   : > { %s3612_s10 = scalar_select %p185_p10, %s3321_s26, %s187_s27  }
  0x5a   : > { %p3616_p8 = por %p194_p12, %p59_p9  ;;  %p3622_p2 = por %p200_p11, %p4061_p1 }
  0x5b   : > { %4089 = sst [smem:[#allocation31_spill]] %s3612_s10  ;;  %p226_p4 = scmp.eq.s32.totalorder %s3498_s15, 3 }
  0x5c   : > { %s4091_s18 = scalar_select %p3622_p2, 1, 0 }
  0x5d   : > { %s4092_s21 = sadd.s32 4294967294, %s3365_s14   ;;  %p2900_p10 = scmp.lt.s32.totalorder %s3365_s14, 4 }
  0x5e   : > { %p232_p7 = scmp.eq.s32.totalorder %s4092_s21, 3  ;;  %s294_s24 = sand.u32 1, %s3345_s9  }
  0x5f   : > { %p4093_p9 = scmp.ne.s32.totalorder %s3345_s9, %s3341_s8  ;;  %p4096_p6 = scmp.ne.s32.totalorder %s3341_s8, %s3337_s30 }
  0x60   : > { %s2742_s3 = sshll.u32 %s294_s24, 4  ;;  %s2743_s4 = sshll.u32 %s3357_s12, 1 }
  0x61   : > { %p3634_p12 = por %p226_p4, %p4093_p9  ;;  %p3641_p13 = por %p232_p7, %p4096_p6 }
  0x62   : > { %s2744_s19 = sshll.u32 %s3361_s13, 2  ;;  %s298_s16 = scalar_lea.vmem [#allocation4], %s2742_s3 }
  0x63   : > { %s4094_s22 = scalar_select %p3634_p12, 1, 0 }
  0x64   : > { %s4097_s27 = scalar_select %p3641_p13, 1, 0 }
  0x65   : > { %4095 = sst [smem:[#allocation32_spill]] %s4094_s22  ;;  %s308_s2 = sshll.u32 %s298_s16, 4  ;;  %s309_s2 = int_to_ptr.vmem [resolvable:$true] %s308_s2 }
  0x66   : > { %4098 = sst [smem:[#allocation33_spill]] %s4097_s27  ;;  %s304_s21 = sadd.s32 %s2744_s19, %s2743_s4 }
  0x67   : > { %s2745_s11 = sshll.u32 %s304_s21, 7  ;;  %p3651_p11 = pnand %p2900_p10, %p3564_p5 }
  0x68   : > { %s4100_s0 = sld [smem:[#allocation34_spill]]  ;;  %p3662_p6 = pnand %p2900_p10, %p3586_p0 }
  0x69   : > { %p3670_p4 = pnand %p2900_p10, %p3616_p8  ;;  %s295_s4 = scalar_lea.sflag [#allocation5], %s294_s24 }
  0x6a   : > { %p3123_p5 = pneg %p3651_p11  ;;  %s3134_s16 = scalar_lea.vmem %s309_s2, 256 }
  0x6b   : > { %p3135_p7 = scmp.ne.s32.totalorder %s309_s2, %s3134_s16  ;;  %s3374_s30 = smov [#allocation4]  }
  0x6d   : > { %p3137_p9 = pnand %p3135_p7, %p3123_p5 }
  0x6e   : > { %s306_s22 = scalar_lea.hbm %s4100_s0, %s2745_s11  ;;  %s3139_s11 = sshll.u32 %s3374_s30, 4  ;;  %s3140_s11 = int_to_ptr.vmem [resolvable:$false] %s3139_s11 }
  0x6f   : > { %p3138_p1 = pneg %p3137_p9  ;;  %s3141_s19 = scalar_lea.vmem %s3140_s11, 512 }
  0x70   : > { %p3142_p0 = scmp.lt.s32.totalorder %s309_s2, %s3140_s11  ;;  %p3143_p13 = scmp.lt.s32.totalorder %s3141_s19, %s3134_s16 }
  0x72   : > { %p3144_p12 = por %p3143_p13, %p3142_p0 }
  0x74   : > { %p3145_p2 = pnand %p3144_p12, %p3138_p1 }
  0x76   : > { %3148 = shalt.err (!%p3145_p2)
}
  0x77   : > { %2886 = dma.hbm_to_vmem [thread:$0]  (!%p3651_p11), %s306_s22, 256, %s309_s2, %s295_s4  }
  0x78   : > { %s315_s7 = sand.u32 1, %s3365_s14   ;;  %s317_s5 = sand.u32 1, %s3333_s29  }
  0x79   : > { %s2746_s10 = sshll.u32 %s317_s5, 6  ;;  %s2788_s23 = sshll.u32 %s3361_s13, 10 }
  0x7a   : > { %s4103_s1 = sld [smem:[#allocation35_spill]]  ;;  %s319_s16 = scalar_lea.vmem [#allocation7], %s2746_s10 }
  0x7b   : > { %s326_s11 = sshll.u32 %s319_s16, 4  ;;  %s336_s19 = sand.u32 1, %s3321_s26   ;;  %s327_s11 = int_to_ptr.vmem [resolvable:$true] %s326_s11 }
  0x7c   : > { %s316_s0 = scalar_lea.sflag [#allocation8], %s315_s7  ;;  %p3151_p1 = pneg %p3662_p6 }
  0x7d   : > { %s3162_s9 = scalar_lea.vmem %s327_s11, 1024  ;;  %s3375_s2 = smov [#allocation7]  }
  0x7e   : > { %p3163_p8 = scmp.ne.s32.totalorder %s327_s11, %s3162_s9  ;;  %s3167_s22 = sshll.u32 %s3375_s2, 4  ;;  %s3168_s22 = int_to_ptr.vmem [resolvable:$false] %s3167_s22 }
  0x7f   : > { %s3169_s4 = scalar_lea.vmem %s3168_s22, 2048  ;;  %p3170_p10 = scmp.lt.s32.totalorder %s327_s11, %s3168_s22 }
  0x80   : > { %s325_s30 = scalar_lea.hbm %s4103_s1, %s2788_s23  ;;  %p3165_p13 = pnand %p3163_p8, %p3151_p1 }
  0x81   : > { %p3171_p12 = scmp.lt.s32.totalorder %s3169_s4, %s3162_s9 }
  0x82   : > { %p3166_p2 = pneg %p3165_p13 }
  0x83   : > { %p3172_p11 = por %p3171_p12, %p3170_p10 }
  0x85   : > { %p3173_p5 = pnand %p3172_p11, %p3166_p2 }
  0x87   : > { %3176 = shalt.err (!%p3173_p5)
}
  0x88   : > { %s4104_s5 = smov 16   ;;  %s4105_s10 = smov 256  }
  0x89   : > { %2889 = dma.hbm_to_vmem [thread:$0]  (!%p3662_p6), %s325_s30, 1024, %s327_s11, %s316_s0, %s4105_s10, %s4105_s10, %s4104_s5  }
  0x8a   : > { %s2749_s7 = sshll.u32 %s336_s19, 4  ;;  %s2750_s23 = sshll.u32 %s3357_s12, 7 }
  0x8b   : > { %s345_s16 = scalar_lea.hbm %s4043_s6, %s2750_s23  ;;  %s340_s2 = scalar_lea.vmem [#allocation13], %s2749_s7 }
  0x8c   : > { %s346_s22 = sshll.u32 %s340_s2, 4  ;;  %s337_s9 = scalar_lea.sflag [#allocation14], %s336_s19  ;;  %s347_s22 = int_to_ptr.vmem [resolvable:$true] %s346_s22 }
  0x8d   : > { %p3179_p7 = pneg %p3670_p4  ;;  %s3190_s4 = scalar_lea.vmem %s347_s22, 256 }
  0x8e   : > { %p3191_p9 = scmp.ne.s32.totalorder %s347_s22, %s3190_s4  ;;  %s3376_s27 = smov [#allocation13]  }
  0x8f   : > { %s3195_s1 = sshll.u32 %s3376_s27, 4  ;;  %s3196_s1 = int_to_ptr.vmem [resolvable:$false] %s3195_s1 }
  0x90   : > { %p3193_p0 = pnand %p3191_p9, %p3179_p7  ;;  %s3197_s0 = scalar_lea.vmem %s3196_s1, 512 }
  0x91   : > { %p3198_p6 = scmp.lt.s32.totalorder %s347_s22, %s3196_s1  ;;  %p3199_p8 = scmp.lt.s32.totalorder %s3197_s0, %s3190_s4 }
  0x92   : > { %p3194_p1 = pneg %p3193_p0 }
  0x93   : > { %p3200_p13 = por %p3199_p8, %p3198_p6 }
  0x95   : > { %p3201_p2 = pnand %p3200_p13, %p3194_p1 }
  0x97   : > { %3204 = shalt.err (!%p3201_p2)
}
  0x98   : > { %s3377_s30 = smov 128   ;;  %s3378_s11 = smov 8  }
  0x99   : > { %2892 = dma.hbm_to_vmem [thread:$0]  (!%p3670_p4), %s345_s16, 256, %s347_s22, %s337_s9, %s4105_s10, %s3377_s30, %s3378_s11  }
  0x9a   : > { %358 = sbr.rel (%p3503_p3) target bundleno = 1823 (0x71f), region = 48  ;;  %s3704_s5 = sand.u32 (!%p3503_p3), 1, %s3341_s8  }
  0x9b   : > { %s2752_s1 = sshll.u32 (!%p3503_p3), %s3704_s5, 4  ;;  %s361_s7 = scalar_lea.sflag (!%p3503_p3), [#allocation5], %s3704_s5 }
  0x9c   : > { %s364_s23 = scalar_lea.vmem (!%p3503_p3), [#allocation4], %s2752_s1  ;;  %p4107_p10 = scmp.ne.s32.totalorder (!%p3503_p3), %s4084_s20, 0 }
  0x9f   : > { %3288 = dma.done.wait (%p4107_p10), %s361_s7, 256  }
  0xa0   : > { %3290 = vsyncadd (%p4107_p10), %s361_s7, 4294967040  ;;  %s369_s3 = sand.u32 1, %s3498_s15   ;;  %s371_s10 = sand.u32 1, %s3329_s28  }
  0xa1   : > { %s2753_s24 = sshll.u32 %s371_s10, 6  ;;  %s370_s21 = scalar_lea.sflag [#allocation8], %s369_s3 }
  0xa2   : > { %s3714_s16 = scalar_lea.vmem [#allocation7], %s2753_s24  ;;  %p4108_p3 = scmp.ne.s32.totalorder %s4086_s17, 0 }
  0xa4   : > { %3292 = dma.done.wait (%p4108_p3), %s370_s21, 1024  }
  0xa5   : > { %3294 = vsyncadd (%p4108_p3), %s370_s21, 4294966272  ;;  %p4109_p4 = scmp.eq.s32.totalorder %s3498_s15, 0 }
  0xa7   : > { %3296 = dma.done.wait (%p4109_p4), [#allocation8], 8192   ;;  %p4110_p12 = pmov %p4109_p4 }
  0xa8   : > { %p4111_p11 = pmov %p4109_p4 }
  0xa9   : > { %3298 = vsyncadd (%p4110_p12), [#allocation8], 4294959104 }
  0xaa   : > { %3300 = dma.done.wait (%p4111_p11), [#allocation11], 24576   ;;  %p4112_p5 = pmov %p4109_p4 }
  0xab   : > { %s390_s20 = sand.u32 1, %s3317_s25   ;;  %p4113_p7 = scmp.ne.s32.totalorder %s4091_s18, 0 }
  0xac   : > { %3302 = vsyncadd (%p4112_p5), [#allocation11], 4294942720  ;;  %s3729_s2 = sshll.u32 %s390_s20, 4  ;;  %s391_s17 = scalar_lea.sflag [#allocation14], %s390_s20 }
  0xad   : > { %s394_s22 = scalar_lea.vmem [#allocation13], %s3729_s2 }
  0xae   : > { %3304 = dma.done.wait (%p4113_p7), %s391_s17, 256  }
  0xaf   : > { %3306 = vsyncadd (%p4113_p7), %s391_s17, 4294967040  ;;  %v3736_v0 = vld [vmem:[%s364_s23] sm:$0xff]  ;;  %v3738_v1 = vld [vmem:[%s364_s23 + $0x8] sm:$0xff]  ;;  %s3740_s9 = scalar_lea.vmem [#allocation15], %s2752_s1  ;;  %s4114_s15 = sld [smem:[#allocation24_spill]] }
  0xb5   : > { %p2759_p9 = scmp.ne.s32.totalorder %s4114_s15, 0 }
  0xb7   : > { %440 = sbr.rel (%p2759_p9) target bundleno = 515 (0x203), region = 76 }
  0xbc   : > { %v510_v2 = vld [vmem:[#allocation10 + $0x1e8] sm:$0xff]  ;;  %v512_v3 = vld [vmem:[#allocation10 + $0x1f8] sm:$0xff]  ;;  %v509_v4 = vld [vmem:[#allocation10 + $0x1e0] sm:$0xff] }
  0xbd   : > { %577 = vmatprep.subr.mxu0 %v510_v2  ;;  %666 = vmatprep.subr.mxu1 %v512_v3  ;;  %v511_v5 = vld [vmem:[#allocation10 + $0x1f0] sm:$0xff]  ;;  %v506_v6 = vld [vmem:[#allocation10 + $0x1c8] sm:$0xff]  ;;  %v508_v7 = vld [vmem:[#allocation10 + $0x1d8] sm:$0xff] }
  0xbe   : > { %578 = vmatpush1.msra.mxu0 %v509_v4  ;;  %667 = vmatpush1.msra.mxu1 %v511_v5  ;;  %v505_v8 = vld [vmem:[#allocation10 + $0x1c0] sm:$0xff]  ;;  %v507_v9 = vld [vmem:[#allocation10 + $0x1d0] sm:$0xff]  ;;  %v502_v10 = vld [vmem:[#allocation10 + $0x1a8] sm:$0xff] }
  0xbf   : > { %579 = vmatprep.subr.mxu0 %v506_v6  ;;  %668 = vmatprep.subr.mxu1 %v508_v7  ;;  %v504_v11 = vld [vmem:[#allocation10 + $0x1b8] sm:$0xff]  ;;  %v501_v12 = vld [vmem:[#allocation10 + $0x1a0] sm:$0xff]  ;;  %v503_v13 = vld [vmem:[#allocation10 + $0x1b0] sm:$0xff] }
  0xc0   : > { %580 = vmatpush1.msra.mxu0 %v505_v8  ;;  %669 = vmatpush1.msra.mxu1 %v507_v9  ;;  %v498_v14 = vld [vmem:[#allocation10 + $0x188] sm:$0xff]  ;;  %v500_v15 = vld [vmem:[#allocation10 + $0x198] sm:$0xff]  ;;  %v497_v16 = vld [vmem:[#allocation10 + $0x180] sm:$0xff] }
  0xc1   : > { %581 = vmatprep.subr.mxu0 %v502_v10  ;;  %670 = vmatprep.subr.mxu1 %v504_v11  ;;  %v499_v17 = vld [vmem:[#allocation10 + $0x190] sm:$0xff]  ;;  %v494_v18 = vld [vmem:[#allocation10 + $0x168] sm:$0xff]  ;;  %v496_v19 = vld [vmem:[#allocation10 + $0x178] sm:$0xff] }
  0xc2   : > { %582 = vmatpush1.msra.mxu0 %v501_v12  ;;  %671 = vmatpush1.msra.mxu1 %v503_v13  ;;  %v493_v20 = vld [vmem:[#allocation10 + $0x160] sm:$0xff]  ;;  %v495_v21 = vld [vmem:[#allocation10 + $0x170] sm:$0xff]  ;;  %v490_v22 = vld [vmem:[#allocation10 + $0x148] sm:$0xff] }
  0xc3   : > { %583 = vmatprep.subr.mxu0 %v498_v14  ;;  %672 = vmatprep.subr.mxu1 %v500_v15  ;;  %v492_v23 = vld [vmem:[#allocation10 + $0x158] sm:$0xff]  ;;  %v489_v24 = vld [vmem:[#allocation10 + $0x140] sm:$0xff]  ;;  %v491_v25 = vld [vmem:[#allocation10 + $0x150] sm:$0xff] }
  0xc4   : > { %584 = vmatpush1.msra.mxu0 %v497_v16  ;;  %673 = vmatpush1.msra.mxu1 %v499_v17  ;;  %v486_v26 = vld [vmem:[#allocation10 + $0x128] sm:$0xff]  ;;  %v488_v27 = vld [vmem:[#allocation10 + $0x138] sm:$0xff]  ;;  %v485_v28 = vld [vmem:[#allocation10 + $0x120] sm:$0xff] }
  0xc5   : > { %585 = vmatprep.subr.mxu0 %v494_v18  ;;  %674 = vmatprep.subr.mxu1 %v496_v19  ;;  %v487_v29 = vld [vmem:[#allocation10 + $0x130] sm:$0xff]  ;;  %v482_v30 = vld [vmem:[#allocation10 + $0x108] sm:$0xff]  ;;  %v484_v31 = vld [vmem:[#allocation10 + $0x118] sm:$0xff] }
  0xc6   : > { %586 = vmatpush1.msra.mxu0 %v493_v20  ;;  %675 = vmatpush1.msra.mxu1 %v495_v21  ;;  %v481_v32 = vld [vmem:[#allocation10 + $0x100] sm:$0xff]  ;;  %v483_v33 = vld [vmem:[#allocation10 + $0x110] sm:$0xff]  ;;  %v478_v34 = vld [vmem:[#allocation10 + $0xe8] sm:$0xff] }
  0xc7   : > { %587 = vmatprep.subr.mxu0 %v490_v22  ;;  %676 = vmatprep.subr.mxu1 %v492_v23  ;;  %v480_v35 = vld [vmem:[#allocation10 + $0xf8] sm:$0xff]  ;;  %v477_v36 = vld [vmem:[#allocation10 + $0xe0] sm:$0xff]  ;;  %v479_v37 = vld [vmem:[#allocation10 + $0xf0] sm:$0xff] }
  0xc8   : > { %588 = vmatpush1.msra.mxu0 %v489_v24  ;;  %677 = vmatpush1.msra.mxu1 %v491_v25  ;;  %v474_v38 = vld [vmem:[#allocation10 + $0xc8] sm:$0xff]  ;;  %v476_v39 = vld [vmem:[#allocation10 + $0xd8] sm:$0xff]  ;;  %v473_v40 = vld [vmem:[#allocation10 + $0xc0] sm:$0xff] }
  0xc9   : > { %589 = vmatprep.subr.mxu0 %v486_v26  ;;  %678 = vmatprep.subr.mxu1 %v488_v27  ;;  %v475_v41 = vld [vmem:[#allocation10 + $0xd0] sm:$0xff]  ;;  %v470_v42 = vld [vmem:[#allocation10 + $0xa8] sm:$0xff]  ;;  %v472_v43 = vld [vmem:[#allocation10 + $0xb8] sm:$0xff] }
  0xca   : > { %590 = vmatpush1.msra.mxu0 %v485_v28  ;;  %679 = vmatpush1.msra.mxu1 %v487_v29  ;;  %v469_v44 = vld [vmem:[#allocation10 + $0xa0] sm:$0xff]  ;;  %v471_v45 = vld [vmem:[#allocation10 + $0xb0] sm:$0xff]  ;;  %v466_v46 = vld [vmem:[#allocation10 + $0x88] sm:$0xff] }
  0xcb   : > { %591 = vmatprep.subr.mxu0 %v482_v30  ;;  %680 = vmatprep.subr.mxu1 %v484_v31  ;;  %v468_v47 = vld [vmem:[#allocation10 + $0x98] sm:$0xff]  ;;  %v465_v48 = vld [vmem:[#allocation10 + $0x80] sm:$0xff]  ;;  %v467_v49 = vld [vmem:[#allocation10 + $0x90] sm:$0xff] }
  0xcc   : > { %592 = vmatpush1.msra.mxu0 %v481_v32  ;;  %681 = vmatpush1.msra.mxu1 %v483_v33  ;;  %v462_v50 = vld [vmem:[#allocation10 + $0x68] sm:$0xff]  ;;  %v464_v51 = vld [vmem:[#allocation10 + $0x78] sm:$0xff]  ;;  %v461_v52 = vld [vmem:[#allocation10 + $0x60] sm:$0xff] }
  0xcd   : > { %593 = vmatprep.subr.mxu0 %v478_v34  ;;  %682 = vmatprep.subr.mxu1 %v480_v35  ;;  %v463_v53 = vld [vmem:[#allocation10 + $0x70] sm:$0xff]  ;;  %v458_v54 = vld [vmem:[#allocation10 + $0x48] sm:$0xff]  ;;  %v460_v55 = vld [vmem:[#allocation10 + $0x58] sm:$0xff] }
  0xce   : > { %594 = vmatpush1.msra.mxu0 %v477_v36  ;;  %683 = vmatpush1.msra.mxu1 %v479_v37  ;;  %v457_v56 = vld [vmem:[#allocation10 + $0x40] sm:$0xff]  ;;  %v459_v57 = vld [vmem:[#allocation10 + $0x50] sm:$0xff]  ;;  %v454_v58 = vld [vmem:[#allocation10 + $0x28] sm:$0xff] }
  0xcf   : > { %595 = vmatprep.subr.mxu0 %v474_v38  ;;  %684 = vmatprep.subr.mxu1 %v476_v39  ;;  %v456_v59 = vld [vmem:[#allocation10 + $0x38] sm:$0xff]  ;;  %v453_v60 = vld [vmem:[#allocation10 + $0x20] sm:$0xff]  ;;  %v455_v61 = vld [vmem:[#allocation10 + $0x30] sm:$0xff] }
  0xd0   : > { %596 = vmatpush1.msra.mxu0 %v473_v40  ;;  %685 = vmatpush1.msra.mxu1 %v475_v41  ;;  %v450_v62 = vld [vmem:[#allocation10 + $0x8] sm:$0xff]  ;;  %v452_v63 = vld [vmem:[#allocation10 + $0x18] sm:$0xff]  ;;  %v449_v2 = vld [vmem:[#allocation10] sm:$0xff] }
  0xd1   : > { %597 = vmatprep.subr.mxu0 %v470_v42  ;;  %686 = vmatprep.subr.mxu1 %v472_v43  ;;  %v451_v3 = vld [vmem:[#allocation10 + $0x10] sm:$0xff]  ;;  %v574_v4 = vld [vmem:[#allocation10 + $0x3e8] sm:$0xff]  ;;  %v576_v5 = vld [vmem:[#allocation10 + $0x3f8] sm:$0xff] }
  0xd2   : > { %598 = vmatpush1.msra.mxu0 %v469_v44  ;;  %687 = vmatpush1.msra.mxu1 %v471_v45  ;;  %v573_v6 = vld [vmem:[#allocation10 + $0x3e0] sm:$0xff]  ;;  %v575_v7 = vld [vmem:[#allocation10 + $0x3f0] sm:$0xff]  ;;  %v570_v8 = vld [vmem:[#allocation10 + $0x3c8] sm:$0xff] }
  0xd3   : > { %599 = vmatprep.subr.mxu0 %v466_v46  ;;  %688 = vmatprep.subr.mxu1 %v468_v47  ;;  %v572_v9 = vld [vmem:[#allocation10 + $0x3d8] sm:$0xff]  ;;  %v569_v10 = vld [vmem:[#allocation10 + $0x3c0] sm:$0xff]  ;;  %v571_v11 = vld [vmem:[#allocation10 + $0x3d0] sm:$0xff] }
  0xd4   : > { %600 = vmatpush1.msra.mxu0 %v465_v48  ;;  %689 = vmatpush1.msra.mxu1 %v467_v49  ;;  %v566_v12 = vld [vmem:[#allocation10 + $0x3a8] sm:$0xff]  ;;  %v568_v13 = vld [vmem:[#allocation10 + $0x3b8] sm:$0xff]  ;;  %v565_v14 = vld [vmem:[#allocation10 + $0x3a0] sm:$0xff] }
  0xd5   : > { %601 = vmatprep.subr.mxu0 %v462_v50  ;;  %690 = vmatprep.subr.mxu1 %v464_v51  ;;  %v567_v15 = vld [vmem:[#allocation10 + $0x3b0] sm:$0xff]  ;;  %v562_v16 = vld [vmem:[#allocation10 + $0x388] sm:$0xff]  ;;  %v564_v17 = vld [vmem:[#allocation10 + $0x398] sm:$0xff] }
  0xd6   : > { %602 = vmatpush1.msra.mxu0 %v461_v52  ;;  %691 = vmatpush1.msra.mxu1 %v463_v53  ;;  %v561_v18 = vld [vmem:[#allocation10 + $0x380] sm:$0xff]  ;;  %v563_v19 = vld [vmem:[#allocation10 + $0x390] sm:$0xff]  ;;  %v558_v20 = vld [vmem:[#allocation10 + $0x368] sm:$0xff] }
  0xd7   : > { %603 = vmatprep.subr.mxu0 %v458_v54  ;;  %692 = vmatprep.subr.mxu1 %v460_v55  ;;  %v560_v21 = vld [vmem:[#allocation10 + $0x378] sm:$0xff]  ;;  %v557_v22 = vld [vmem:[#allocation10 + $0x360] sm:$0xff]  ;;  %v559_v23 = vld [vmem:[#allocation10 + $0x370] sm:$0xff] }
  0xd8   : > { %604 = vmatpush1.msra.mxu0 %v457_v56  ;;  %693 = vmatpush1.msra.mxu1 %v459_v57  ;;  %v554_v24 = vld [vmem:[#allocation10 + $0x348] sm:$0xff]  ;;  %v556_v25 = vld [vmem:[#allocation10 + $0x358] sm:$0xff]  ;;  %v553_v26 = vld [vmem:[#allocation10 + $0x340] sm:$0xff] }
  0xd9   : > { %605 = vmatprep.subr.mxu0 %v454_v58  ;;  %694 = vmatprep.subr.mxu1 %v456_v59  ;;  %v555_v27 = vld [vmem:[#allocation10 + $0x350] sm:$0xff]  ;;  %v550_v28 = vld [vmem:[#allocation10 + $0x328] sm:$0xff]  ;;  %v552_v29 = vld [vmem:[#allocation10 + $0x338] sm:$0xff] }
  0xda   : > { %606 = vmatpush1.msra.mxu0 %v453_v60  ;;  %695 = vmatpush1.msra.mxu1 %v455_v61  ;;  %v549_v30 = vld [vmem:[#allocation10 + $0x320] sm:$0xff]  ;;  %v551_v31 = vld [vmem:[#allocation10 + $0x330] sm:$0xff]  ;;  %v546_v32 = vld [vmem:[#allocation10 + $0x308] sm:$0xff] }
  0xdb   : > { %607 = vmatprep.subr.mxu0 %v450_v62  ;;  %696 = vmatprep.subr.mxu1 %v452_v63  ;;  %v548_v33 = vld [vmem:[#allocation10 + $0x318] sm:$0xff]  ;;  %v545_v34 = vld [vmem:[#allocation10 + $0x300] sm:$0xff]  ;;  %v547_v35 = vld [vmem:[#allocation10 + $0x310] sm:$0xff] }
  0xdc   : > { %608 = vmatpush1.msra.mxu0 %v449_v2  ;;  %697 = vmatpush1.msra.mxu1 %v451_v3  ;;  %v542_v36 = vld [vmem:[#allocation10 + $0x2e8] sm:$0xff]  ;;  %v544_v37 = vld [vmem:[#allocation10 + $0x2f8] sm:$0xff]  ;;  %v541_v38 = vld [vmem:[#allocation10 + $0x2e0] sm:$0xff] }
  0xdd   : > { %609 = vmatprep.subr.mxu0 %v574_v4  ;;  %698 = vmatprep.subr.mxu1 %v576_v5  ;;  %v543_v39 = vld [vmem:[#allocation10 + $0x2f0] sm:$0xff]  ;;  %v538_v40 = vld [vmem:[#allocation10 + $0x2c8] sm:$0xff]  ;;  %v540_v41 = vld [vmem:[#allocation10 + $0x2d8] sm:$0xff] }
  0xde   : > { %610 = vmatpush2.msra.mxu0 %v573_v6  ;;  %699 = vmatpush2.msra.mxu1 %v575_v7  ;;  %v537_v42 = vld [vmem:[#allocation10 + $0x2c0] sm:$0xff]  ;;  %v539_v43 = vld [vmem:[#allocation10 + $0x2d0] sm:$0xff]  ;;  %v534_v44 = vld [vmem:[#allocation10 + $0x2a8] sm:$0xff] }
  0xdf   : > { %611 = vmatprep.subr.mxu0 %v570_v8  ;;  %700 = vmatprep.subr.mxu1 %v572_v9  ;;  %v536_v45 = vld [vmem:[#allocation10 + $0x2b8] sm:$0xff]  ;;  %v533_v46 = vld [vmem:[#allocation10 + $0x2a0] sm:$0xff]  ;;  %v535_v47 = vld [vmem:[#allocation10 + $0x2b0] sm:$0xff] }
  0xe0   : > { %612 = vmatpush2.msra.mxu0 %v569_v10  ;;  %701 = vmatpush2.msra.mxu1 %v571_v11  ;;  %v530_v48 = vld [vmem:[#allocation10 + $0x288] sm:$0xff]  ;;  %v532_v49 = vld [vmem:[#allocation10 + $0x298] sm:$0xff]  ;;  %v529_v50 = vld [vmem:[#allocation10 + $0x280] sm:$0xff] }
  0xe1   : > { %613 = vmatprep.subr.mxu0 %v566_v12  ;;  %702 = vmatprep.subr.mxu1 %v568_v13  ;;  %v531_v51 = vld [vmem:[#allocation10 + $0x290] sm:$0xff]  ;;  %v526_v52 = vld [vmem:[#allocation10 + $0x268] sm:$0xff]  ;;  %v528_v53 = vld [vmem:[#allocation10 + $0x278] sm:$0xff] }
  0xe2   : > { %614 = vmatpush2.msra.mxu0 %v565_v14  ;;  %703 = vmatpush2.msra.mxu1 %v567_v15  ;;  %v525_v54 = vld [vmem:[#allocation10 + $0x260] sm:$0xff]  ;;  %v527_v55 = vld [vmem:[#allocation10 + $0x270] sm:$0xff]  ;;  %v522_v56 = vld [vmem:[#allocation10 + $0x248] sm:$0xff]  ;;  %v3379_v14 = vmov 1983009808  }
  0xe3   : > { %615 = vmatprep.subr.mxu0 %v562_v16  ;;  %704 = vmatprep.subr.mxu1 %v564_v17  ;;  %v524_v57 = vld [vmem:[#allocation10 + $0x258] sm:$0xff]  ;;  %v521_v58 = vld [vmem:[#allocation10 + $0x240] sm:$0xff]  ;;  %v523_v59 = vld [vmem:[#allocation10 + $0x250] sm:$0xff]  ;;  %v757_v15 = vunpack.c.l.s4 %v3379_v14  ;;  %v759_v16 = vlaneseq  ;;  %v3380_v17 = vmov 1934713408  }
  0xe4   : > { %616 = vmatpush2.msra.mxu0 %v561_v18  ;;  %705 = vmatpush2.msra.mxu1 %v563_v19  ;;  %v518_v60 = vld [vmem:[#allocation10 + $0x228] sm:$0xff]  ;;  %v520_v61 = vld [vmem:[#allocation10 + $0x238] sm:$0xff]  ;;  %v517_v62 = vld [vmem:[#allocation10 + $0x220] sm:$0xff]  ;;  %v788_v18 = vunpack.c.l.s4 %v3380_v17 }
  0xe5   : > { %617 = vmatprep.subr.mxu0 %v558_v20  ;;  %706 = vmatprep.subr.mxu1 %v560_v21  ;;  %v519_v63 = vld [vmem:[#allocation10 + $0x230] sm:$0xff]  ;;  %v514_v2 = vld [vmem:[#allocation10 + $0x208] sm:$0xff]  ;;  %v516_v3 = vld [vmem:[#allocation10 + $0x218] sm:$0xff]  ;;  %v758_v19 = vunpack.c.0.s8 %v757_v15  ;;  %v760_v20 = vshrl.u32 %v759_v16, 7 }
  0xe6   : > { %618 = vmatpush2.msra.mxu0 %v557_v22  ;;  %707 = vmatpush2.msra.mxu1 %v559_v23  ;;  %v513_v4 = vld [vmem:[#allocation10 + $0x200] sm:$0xff]  ;;  %v442_v5 = vld [vmem:[%s3714_s16 + $0x8] sm:$0xff]  ;;  %v515_v6 = vld [vmem:[#allocation10 + $0x210] sm:$0xff]  ;;  %v789_v21 = vunpack.c.0.s8 %v788_v18 }
  0xe7   : > { %619 = vmatprep.subr.mxu0 %v554_v24  ;;  %708 = vmatprep.subr.mxu1 %v556_v25  ;;  %v441_v7 = vld [vmem:[%s3714_s16] sm:$0xff]  ;;  %v444_v8 = vld [vmem:[%s3714_s16 + $0x18] sm:$0xff]  ;;  %v443_v9 = vld [vmem:[%s3714_s16 + $0x10] sm:$0xff]  ;;  %v3751_v22 = vsub.s32 %v758_v19, %v760_v20  ;;  %v3381_v25 = vmov 0.0  }
  0xe8   : > { %620 = vmatpush2.msra.mxu0 %v553_v26  ;;  %709 = vmatpush2.msra.mxu1 %v555_v27  ;;  %v446_v10 = vld [vmem:[%s3714_s16 + $0x28] sm:$0xff]  ;;  %v445_v11 = vld [vmem:[%s3714_s16 + $0x20] sm:$0xff]  ;;  %v448_v12 = vld [vmem:[%s3714_s16 + $0x38] sm:$0xff] }
  0xe9   : > { %621 = vmatprep.subr.mxu0 %v550_v28  ;;  %710 = vmatprep.subr.mxu1 %v552_v29  ;;  %v447_v13 = vld [vmem:[%s3714_s16 + $0x30] sm:$0xff]  ;;  %v3755_v29 = vsub.s32 %v789_v21, %v760_v20 }
  0xea   : > { %622 = vmatpush2.msra.mxu0 %v549_v30  ;;  %711 = vmatpush2.msra.mxu1 %v551_v31 }
  0xeb   : > { %623 = vmatprep.subr.mxu0 %v546_v32  ;;  %712 = vmatprep.subr.mxu1 %v548_v33 }
  0xec   : > { %624 = vmatpush2.msra.mxu0 %v545_v34  ;;  %713 = vmatpush2.msra.mxu1 %v547_v35 }
  0xed   : > { %625 = vmatprep.subr.mxu0 %v542_v36  ;;  %714 = vmatprep.subr.mxu1 %v544_v37 }
  0xee   : > { %626 = vmatpush2.msra.mxu0 %v541_v38  ;;  %715 = vmatpush2.msra.mxu1 %v543_v39 }
  0xef   : > { %627 = vmatprep.subr.mxu0 %v538_v40  ;;  %716 = vmatprep.subr.mxu1 %v540_v41 }
  0xf0   : > { %628 = vmatpush2.msra.mxu0 %v537_v42  ;;  %717 = vmatpush2.msra.mxu1 %v539_v43 }
  0xf1   : > { %629 = vmatprep.subr.mxu0 %v534_v44  ;;  %718 = vmatprep.subr.mxu1 %v536_v45 }
  0xf2   : > { %630 = vmatpush2.msra.mxu0 %v533_v46  ;;  %719 = vmatpush2.msra.mxu1 %v535_v47 }
  0xf3   : > { %631 = vmatprep.subr.mxu0 %v530_v48  ;;  %720 = vmatprep.subr.mxu1 %v532_v49 }
  0xf4   : > { %632 = vmatpush2.msra.mxu0 %v529_v50  ;;  %721 = vmatpush2.msra.mxu1 %v531_v51 }
  0xf5   : > { %633 = vmatprep.subr.mxu0 %v526_v52  ;;  %722 = vmatprep.subr.mxu1 %v528_v53 }
  0xf6   : > { %634 = vmatpush2.msra.mxu0 %v525_v54  ;;  %723 = vmatpush2.msra.mxu1 %v527_v55 }
  0xf7   : > { %635 = vmatprep.subr.mxu0 %v522_v56  ;;  %724 = vmatprep.subr.mxu1 %v524_v57 }
  0xf8   : > { %636 = vmatpush2.msra.mxu0 %v521_v58  ;;  %725 = vmatpush2.msra.mxu1 %v523_v59 }
  0xf9   : > { %637 = vmatprep.subr.mxu0 %v518_v60  ;;  %726 = vmatprep.subr.mxu1 %v520_v61 }
  0xfa   : > { %638 = vmatpush2.msra.mxu0 %v517_v62  ;;  %727 = vmatpush2.msra.mxu1 %v519_v63 }
  0xfb   : > { %639 = vmatprep.subr.mxu0 %v514_v2  ;;  %728 = vmatprep.subr.mxu1 %v516_v3 }
  0xfc   : > { %640 = vmatpush2.msra.mxu0 %v513_v4  ;;  %641 = vmatprep.mubr.f32.mxu0 %v442_v5 }
  0xfd   : > { %729 = vmatpush2.msra.mxu1 %v515_v6  ;;  %730 = vmatprep.mubr.f32.mxu1 %v442_v5 }
  0xfe   : > { %642 = vmatmul.mubr.f32.vlgmr.msra.gmra.mxu0 %v441_v7  ;;  %731 = vmatmul.mubr.f32.vlgmr.msra.gmra.mxu1 %v441_v7 }
  0xff   : > { %647 = vmatprep.mubr.f32.mxu0 %v444_v8  ;;  %736 = vmatprep.mubr.f32.mxu1 %v444_v8 }
 0x102   : > { %648 = vmatmul.mubr.f32.gmra.mxu0 %v443_v9  ;;  %737 = vmatmul.mubr.f32.gmra.mxu1 %v443_v9 }
 0x103   : > { %653 = vmatprep.mubr.f32.mxu0 %v446_v10  ;;  %742 = vmatprep.mubr.f32.mxu1 %v446_v10 }
 0x106   : > { %654 = vmatmul.mubr.f32.gmra.mxu0 %v445_v11  ;;  %743 = vmatmul.mubr.f32.gmra.mxu1 %v445_v11 }
 0x107   : > { %659 = vmatprep.mubr.f32.mxu0 %v448_v12  ;;  %748 = vmatprep.mubr.f32.mxu1 %v448_v12 }
 0x10a   : > { %660 = vmatmul.mubr.f32.gmra.mxu0 %v447_v13  ;;  %749 = vmatmul.mubr.f32.gmra.mxu1 %v447_v13 }
 0x1be   : > { %v643_v23 = vpop.f32.mrf.mxu0  ;;  %v732_v24 = vpop.f32.mrf.mxu1 }
 0x1bf   : > { %v755_v26 = vcombine.high %v643_v23, %v3381_v25  ;;  %v1227_v27 = vcombine.high %v732_v24, %v3381_v25  ;;  %v762_v31 = vrot.slane %v643_v23, %v3751_v22  ;;  %v1234_v32 = vrot.slane %v732_v24, %v3751_v22 }
 0x1c0   : > { %v645_v28 = vpop.f32.mrf.mxu0  ;;  %v734_v30 = vpop.f32.mrf.mxu1 }
 0x1c1   : > { %v770_v33 = vcombine.high %v645_v28, %v3381_v25  ;;  %v777_v34 = vrot.slane %v645_v28, %v3751_v22  ;;  %v769_v35 = vrot.slane %v755_v26, %v3751_v22  ;;  %v1241_v36 = vrot.slane %v1227_v27, %v3751_v22 }
 0x1c2   : > { %v1242_v37 = vcombine.high %v734_v30, %v3381_v25  ;;  %v1249_v38 = vrot.slane %v734_v30, %v3751_v22  ;;  %v649_v39 = vpop.f32.mrf.mxu0  ;;  %v738_v2 = vpop.f32.mrf.mxu1 }
 0x1c3   : > { %v784_v40 = vrot.slane %v770_v33, %v3751_v22  ;;  %v785_v41 = vcombine.low %v762_v31, %v777_v34  ;;  %v786_v42 = vcombine.high %v762_v31, %v777_v34  ;;  %v821_v43 = vcombine.high %v649_v39, %v3381_v25 }
 0x1c4   : > { %v1256_v44 = vrot.slane %v1242_v37, %v3751_v22  ;;  %v1257_v45 = vcombine.low %v1234_v32, %v1249_v38  ;;  %v1258_v46 = vcombine.high %v1234_v32, %v1249_v38  ;;  %v828_v47 = vrot.slane %v649_v39, %v3751_v22  ;;  %v651_v7 = vpop.f32.mrf.mxu0  ;;  %v740_v20 = vpop.f32.mrf.mxu1 }
 0x1c5   : > { %v793_v48 = vrot.slane %v785_v41, %v3755_v29  ;;  %v800_v49 = vrot.slane %v786_v42, %v3755_v29  ;;  %v801_v50 = vcombine.low %v769_v35, %v784_v40  ;;  %v802_v51 = vcombine.high %v769_v35, %v784_v40 }
 0x1c6   : > { %v1265_v52 = vrot.slane %v1257_v45, %v3755_v29  ;;  %v1272_v53 = vrot.slane %v1258_v46, %v3755_v29  ;;  %v1273_v54 = vcombine.low %v1241_v36, %v1256_v44  ;;  %v1274_v55 = vcombine.high %v1241_v36, %v1256_v44  ;;  %v655_v27 = vpop.f32.mrf.mxu0 }
 0x1c7   : > { %v809_v56 = vrot.slane %v801_v50, %v3755_v29  ;;  %v816_v57 = vrot.slane %v802_v51, %v3755_v29  ;;  %v1019_v58 = vcombine.low %v793_v48, %v800_v49  ;;  %v2760_v59 = vcombine.high %v793_v48, %v800_v49 }
 0x1c8   : > { %v1281_v60 = vrot.slane %v1273_v54, %v3755_v29  ;;  %v1288_v61 = vrot.slane %v1274_v55, %v3755_v29  ;;  %v1491_v62 = vcombine.low %v1265_v52, %v1272_v53  ;;  %v2768_v63 = vcombine.high %v1265_v52, %v1272_v53 }
 0x1c9   : > { %v1026_v3 = vrot.slane %v1019_v58, %v3751_v22  ;;  %v1034_v4 = vrot.slane %v2760_v59, %v3751_v22  ;;  %v1035_v5 = vcombine.low %v809_v56, %v816_v57  ;;  %v2761_v6 = vcombine.high %v809_v56, %v816_v57 }
 0x1ca   : > { %v1498_v8 = vrot.slane %v1491_v62, %v3751_v22  ;;  %v1506_v9 = vrot.slane %v2768_v63, %v3751_v22  ;;  %v1507_v10 = vcombine.low %v1281_v60, %v1288_v61  ;;  %v2769_v11 = vcombine.high %v1281_v60, %v1288_v61  ;;  %v744_v61 = vpop.f32.mrf.mxu1 }
 0x1cb   : > { %v1042_v12 = vrot.slane %v1035_v5, %v3751_v22  ;;  %v1050_v13 = vrot.slane %v2761_v6, %v3751_v22  ;;  %v1051_v14 = vcombine.low %v1026_v3, %v1034_v4  ;;  %v835_v15 = vrot.slane %v821_v43, %v3751_v22  ;;  %v657_v4 = vpop.f32.mrf.mxu0 }
 0x1cc   : > { %v1514_v16 = vrot.slane %v1507_v10, %v3751_v22  ;;  %v1522_v17 = vrot.slane %v2769_v11, %v3751_v22  ;;  %v1523_v18 = vcombine.low %v1498_v8, %v1506_v9  ;;  %v1293_v19 = vcombine.high %v738_v2, %v3381_v25 }
 0x1cd   : > { %v1058_v21 = vrot.slane %v1051_v14, %v3755_v29  ;;  %v1059_v23 = vcombine.low %v1042_v12, %v1050_v13  ;;  %v1300_v24 = vrot.slane %v738_v2, %v3751_v22  ;;  %v836_v26 = vcombine.high %v651_v7, %v3381_v25 }
 0x1ce   : > { %v1530_v28 = vrot.slane %v1523_v18, %v3755_v29  ;;  %v1531_v30 = vcombine.low %v1514_v16, %v1522_v17  ;;  %v1307_v31 = vrot.slane %v1293_v19, %v3751_v22  ;;  %v843_v32 = vrot.slane %v651_v7, %v3751_v22  ;;  %v746_v17 = vpop.f32.mrf.mxu1 }
 0x1cf   : > { %v1066_v33 = vrot.slane %v1059_v23, %v3755_v29  ;;  %v850_v34 = vrot.slane %v836_v26, %v3751_v22  ;;  %v1308_v35 = vcombine.high %v740_v20, %v3381_v25  ;;  %v1315_v36 = vrot.slane %v740_v20, %v3751_v22 }
 0x1d0   : > { %v1538_v37 = vrot.slane %v1531_v30, %v3755_v29  ;;  %v851_v38 = vcombine.low %v828_v47, %v843_v32  ;;  %v852_v39 = vcombine.high %v828_v47, %v843_v32  ;;  %v887_v40 = vcombine.high %v655_v27, %v3381_v25 }
 0x1d1   : > { %v1067_v41 = vcombine.low %v1058_v21, %v1066_v33  ;;  %v1068_v42 = vcombine.high %v1058_v21, %v1066_v33  ;;  %v867_v43 = vcombine.low %v835_v15, %v850_v34  ;;  %v868_v44 = vcombine.high %v835_v15, %v850_v34 }
 0x1d2   : > { %v1539_v45 = vcombine.low %v1530_v28, %v1538_v37  ;;  %v1540_v46 = vcombine.high %v1530_v28, %v1538_v37  ;;  %v859_v48 = vrot.slane %v851_v38, %v3755_v29  ;;  %v866_v49 = vrot.slane %v852_v39, %v3755_v29  ;;  %v661_v37 = vpop.f32.mrf.mxu0 }
 0x1d3   : > { %1219 = vst [vmem:[#allocation2 + $0x30] sm:$0xff] %v1067_v41  ;;  %1223 = vst [vmem:[#allocation2 + $0x8] sm:$0xff] %v1068_v42  ;;  %v875_v50 = vrot.slane %v867_v43, %v3755_v29  ;;  %v882_v51 = vrot.slane %v868_v44, %v3755_v29  ;;  %v1322_v47 = vrot.slane %v1308_v35, %v3751_v22 }
 0x1d4   : > { %v1323_v52 = vcombine.low %v1300_v24, %v1315_v36  ;;  %1691 = vst [vmem:[#allocation3] sm:$0xff] %v1539_v45  ;;  %1695 = vst [vmem:[#allocation3 + $0x28] sm:$0xff] %v1540_v46  ;;  %v1069_v53 = vcombine.low %v859_v48, %v866_v49  ;;  %v2762_v54 = vcombine.high %v859_v48, %v866_v49 }
 0x1d5   : > { %v1324_v55 = vcombine.high %v1300_v24, %v1315_v36  ;;  %v894_v56 = vrot.slane %v655_v27, %v3751_v22  ;;  %v1085_v57 = vcombine.low %v875_v50, %v882_v51  ;;  %v2763_v58 = vcombine.high %v875_v50, %v882_v51 }
 0x1d6   : > { %v1331_v59 = vrot.slane %v1323_v52, %v3755_v29  ;;  %v1339_v60 = vcombine.low %v1307_v31, %v1322_v47  ;;  %v1076_v62 = vrot.slane %v1069_v53, %v3751_v22  ;;  %v1084_v63 = vrot.slane %v2762_v54, %v3751_v22 }
 0x1d7   : > { %v1338_v2 = vrot.slane %v1324_v55, %v3755_v29  ;;  %v1340_v3 = vcombine.high %v1307_v31, %v1322_v47  ;;  %v1092_v5 = vrot.slane %v1085_v57, %v3751_v22  ;;  %v1100_v6 = vrot.slane %v2763_v58, %v3751_v22 }
 0x1d8   : > { %v1347_v7 = vrot.slane %v1339_v60, %v3755_v29  ;;  %v901_v8 = vrot.slane %v887_v40, %v3751_v22  ;;  %v1101_v9 = vcombine.low %v1076_v62, %v1084_v63  ;;  %v1359_v14 = vcombine.high %v744_v61, %v3381_v25 }
 0x1d9   : > { %v1354_v10 = vrot.slane %v1340_v3, %v3755_v29  ;;  %v1541_v11 = vcombine.low %v1331_v59, %v1338_v2  ;;  %v2770_v12 = vcombine.high %v1331_v59, %v1338_v2  ;;  %v1109_v13 = vcombine.low %v1092_v5, %v1100_v6 }
 0x1da   : > { %v1366_v15 = vrot.slane %v744_v61, %v3751_v22  ;;  %v902_v16 = vcombine.high %v657_v4, %v3381_v25  ;;  %v1108_v18 = vrot.slane %v1101_v9, %v3755_v29  ;;  %v1373_v26 = vrot.slane %v1359_v14, %v3751_v22  ;;  %v663_v9 = vpop.f32.mrf.mxu0 }
 0x1db   : > { %v1548_v19 = vrot.slane %v1541_v11, %v3751_v22  ;;  %v1556_v20 = vrot.slane %v2770_v12, %v3751_v22  ;;  %v1557_v21 = vcombine.low %v1347_v7, %v1354_v10  ;;  %v1116_v23 = vrot.slane %v1109_v13, %v3755_v29 }
 0x1dc   : > { %v2771_v24 = vcombine.high %v1347_v7, %v1354_v10  ;;  %v909_v27 = vrot.slane %v657_v4, %v3751_v22  ;;  %v916_v31 = vrot.slane %v902_v16, %v3751_v22  ;;  %v1374_v32 = vcombine.high %v746_v17, %v3381_v25  ;;  %v750_v4 = vpop.f32.mrf.mxu1 }
 0x1dd   : > { %v1564_v28 = vrot.slane %v1557_v21, %v3751_v22  ;;  %v1573_v30 = vcombine.low %v1548_v19, %v1556_v20  ;;  %v1117_v33 = vcombine.low %v1108_v18, %v1116_v23  ;;  %v1118_v34 = vcombine.high %v1108_v18, %v1116_v23 }
 0x1de   : > { %v1572_v35 = vrot.slane %v2771_v24, %v3751_v22  ;;  %v917_v36 = vcombine.low %v894_v56, %v909_v27  ;;  %v918_v39 = vcombine.high %v894_v56, %v909_v27  ;;  %v933_v40 = vcombine.low %v901_v8, %v916_v31  ;;  %v752_v21 = vpop.f32.mrf.mxu1 }
 0x1df   : > { %v1580_v38 = vrot.slane %v1573_v30, %v3755_v29  ;;  %v934_v41 = vcombine.high %v901_v8, %v916_v31  ;;  %1220 = vst [vmem:[#allocation2] sm:$0xff] %v1117_v33  ;;  %1224 = vst [vmem:[#allocation2 + $0x20] sm:$0xff] %v1118_v34  ;;  %v1381_v44 = vrot.slane %v746_v17, %v3751_v22 }
 0x1e0   : > { %v1581_v42 = vcombine.low %v1564_v28, %v1572_v35  ;;  %v925_v43 = vrot.slane %v917_v36, %v3755_v29  ;;  %v1388_v45 = vrot.slane %v1374_v32, %v3751_v22  ;;  %v932_v46 = vrot.slane %v918_v39, %v3755_v29 }
 0x1e1   : > { %v941_v48 = vrot.slane %v933_v40, %v3755_v29  ;;  %v948_v49 = vrot.slane %v934_v41, %v3755_v29  ;;  %v953_v50 = vcombine.high %v661_v37, %v3381_v25  ;;  %v1389_v47 = vcombine.low %v1366_v15, %v1381_v44 }
 0x1e2   : > { %v1588_v51 = vrot.slane %v1581_v42, %v3755_v29  ;;  %v1390_v52 = vcombine.high %v1366_v15, %v1381_v44  ;;  %v1405_v53 = vcombine.low %v1373_v26, %v1388_v45  ;;  %v1119_v54 = vcombine.low %v925_v43, %v932_v46 }
 0x1e3   : > { %v2764_v55 = vcombine.high %v925_v43, %v932_v46  ;;  %v1135_v56 = vcombine.low %v941_v48, %v948_v49  ;;  %v2765_v57 = vcombine.high %v941_v48, %v948_v49  ;;  %v1397_v60 = vrot.slane %v1389_v47, %v3755_v29 }
 0x1e4   : > { %v1589_v58 = vcombine.low %v1580_v38, %v1588_v51  ;;  %v1590_v59 = vcombine.high %v1580_v38, %v1588_v51  ;;  %v1404_v61 = vrot.slane %v1390_v52, %v3755_v29  ;;  %v1126_v62 = vrot.slane %v1119_v54, %v3751_v22 }
 0x1e5   : > { %v1134_v63 = vrot.slane %v2764_v55, %v3751_v22  ;;  %v1142_v2 = vrot.slane %v1135_v56, %v3751_v22  ;;  %v1150_v3 = vrot.slane %v2765_v57, %v3751_v22  ;;  %v1406_v5 = vcombine.high %v1373_v26, %v1388_v45 }
 0x1e6   : > { %1692 = vst [vmem:[#allocation3 + $0x18] sm:$0xff] %v1589_v58  ;;  %1696 = vst [vmem:[#allocation3 + $0x8] sm:$0xff] %v1590_v59  ;;  %v1413_v6 = vrot.slane %v1405_v53, %v3755_v29  ;;  %v1591_v7 = vcombine.low %v1397_v60, %v1404_v61  ;;  %v2772_v8 = vcombine.high %v1397_v60, %v1404_v61 }
 0x1e7   : > { %v1151_v10 = vcombine.low %v1126_v62, %v1134_v63  ;;  %v1159_v11 = vcombine.low %v1142_v2, %v1150_v3  ;;  %v960_v12 = vrot.slane %v661_v37, %v3751_v22  ;;  %v1420_v13 = vrot.slane %v1406_v5, %v3755_v29 }
 0x1e8   : > { %v1598_v14 = vrot.slane %v1591_v7, %v3751_v22  ;;  %v1606_v15 = vrot.slane %v2772_v8, %v3751_v22  ;;  %v1425_v16 = vcombine.high %v750_v4, %v3381_v25  ;;  %v967_v19 = vrot.slane %v953_v50, %v3751_v22 }
 0x1e9   : > { %v1158_v17 = vrot.slane %v1151_v10, %v3755_v29  ;;  %v1166_v18 = vrot.slane %v1159_v11, %v3755_v29  ;;  %v968_v20 = vcombine.high %v663_v9, %v3381_v25  ;;  %v1607_v23 = vcombine.low %v1413_v6, %v1420_v13 }
 0x1ea   : > { %v2773_v24 = vcombine.high %v1413_v6, %v1420_v13  ;;  %v1623_v26 = vcombine.low %v1598_v14, %v1606_v15  ;;  %v1432_v27 = vrot.slane %v750_v4, %v3751_v22  ;;  %v975_v31 = vrot.slane %v663_v9, %v3751_v22 }
 0x1eb   : > { %v1167_v28 = vcombine.low %v1158_v17, %v1166_v18  ;;  %v1168_v30 = vcombine.high %v1158_v17, %v1166_v18  ;;  %v982_v32 = vrot.slane %v968_v20, %v3751_v22  ;;  %v1614_v33 = vrot.slane %v1607_v23, %v3751_v22 }
 0x1ec   : > { %v1622_v34 = vrot.slane %v2773_v24, %v3751_v22  ;;  %v1439_v35 = vrot.slane %v1425_v16, %v3751_v22  ;;  %v1440_v36 = vcombine.high %v752_v21, %v3381_v25  ;;  %v983_v37 = vcombine.low %v960_v12, %v975_v31 }
 0x1ed   : > { %1221 = vst [vmem:[#allocation2 + $0x18] sm:$0xff] %v1167_v28  ;;  %1225 = vst [vmem:[#allocation2 + $0x28] sm:$0xff] %v1168_v30  ;;  %v984_v38 = vcombine.high %v960_v12, %v975_v31  ;;  %v999_v39 = vcombine.low %v967_v19, %v982_v32  ;;  %v1000_v40 = vcombine.high %v967_v19, %v982_v32 }
 0x1ee   : > { %v1630_v41 = vrot.slane %v1623_v26, %v3755_v29  ;;  %v1631_v42 = vcombine.low %v1614_v33, %v1622_v34  ;;  %v1447_v43 = vrot.slane %v752_v21, %v3751_v22  ;;  %v1454_v44 = vrot.slane %v1440_v36, %v3751_v22 }
 0x1ef   : > { %v991_v45 = vrot.slane %v983_v37, %v3755_v29  ;;  %v998_v46 = vrot.slane %v984_v38, %v3755_v29  ;;  %v1007_v48 = vrot.slane %v999_v39, %v3755_v29  ;;  %v1014_v25 = vrot.slane %v1000_v40, %v3755_v29 }
 0x1f0   : > { %v1638_v49 = vrot.slane %v1631_v42, %v3755_v29  ;;  %v1455_v50 = vcombine.low %v1432_v27, %v1447_v43  ;;  %v1456_v51 = vcombine.high %v1432_v27, %v1447_v43  ;;  %v1471_v47 = vcombine.low %v1439_v35, %v1454_v44 }
 0x1f1   : > { %v1169_v52 = vcombine.low %v991_v45, %v998_v46  ;;  %v2766_v53 = vcombine.high %v991_v45, %v998_v46  ;;  %v1185_v54 = vcombine.low %v1007_v48, %v1014_v25  ;;  %v2767_v55 = vcombine.high %v1007_v48, %v1014_v25 }
 0x1f2   : > { %v1639_v56 = vcombine.low %v1630_v41, %v1638_v49  ;;  %v1640_v57 = vcombine.high %v1630_v41, %v1638_v49  ;;  %v1463_v58 = vrot.slane %v1455_v50, %v3755_v29  ;;  %v1470_v59 = vrot.slane %v1456_v51, %v3755_v29 }
 0x1f3   : > { %v1176_v60 = vrot.slane %v1169_v52, %v3751_v22  ;;  %v1184_v61 = vrot.slane %v2766_v53, %v3751_v22  ;;  %v1192_v62 = vrot.slane %v1185_v54, %v3751_v22  ;;  %v1200_v63 = vrot.slane %v2767_v55, %v3751_v22 }
 0x1f4   : > { %1693 = vst [vmem:[#allocation3 + $0x10] sm:$0xff] %v1639_v56  ;;  %1697 = vst [vmem:[#allocation3 + $0x30] sm:$0xff] %v1640_v57  ;;  %v1472_v2 = vcombine.high %v1439_v35, %v1454_v44  ;;  %v1479_v3 = vrot.slane %v1471_v47, %v3755_v29  ;;  %v1641_v4 = vcombine.low %v1463_v58, %v1470_v59 }
 0x1f5   : > { %v2774_v5 = vcombine.high %v1463_v58, %v1470_v59  ;;  %v1201_v6 = vcombine.low %v1176_v60, %v1184_v61  ;;  %v1209_v7 = vcombine.low %v1192_v62, %v1200_v63 }
 0x1f6   : > { %v1486_v8 = vrot.slane %v1472_v2, %v3755_v29  ;;  %v1648_v9 = vrot.slane %v1641_v4, %v3751_v22 }
 0x1f7   : > { %v1656_v10 = vrot.slane %v2774_v5, %v3751_v22  ;;  %v1208_v11 = vrot.slane %v1201_v6, %v3755_v29  ;;  %v1216_v12 = vrot.slane %v1209_v7, %v3755_v29 }
 0x1f8   : > { %v1657_v13 = vcombine.low %v1479_v3, %v1486_v8  ;;  %v2775_v14 = vcombine.high %v1479_v3, %v1486_v8 }
 0x1f9   : > { %v1217_v15 = vcombine.low %v1208_v11, %v1216_v12  ;;  %v1218_v16 = vcombine.high %v1208_v11, %v1216_v12  ;;  %v1673_v19 = vcombine.low %v1648_v9, %v1656_v10 }
 0x1fa   : > { %v1664_v17 = vrot.slane %v1657_v13, %v3751_v22  ;;  %v1672_v18 = vrot.slane %v2775_v14, %v3751_v22 }
 0x1fb   : > { %1222 = vst [vmem:[#allocation2 + $0x10] sm:$0xff] %v1217_v15  ;;  %1226 = vst [vmem:[#allocation2 + $0x38] sm:$0xff] %v1218_v16  ;;  %v1680_v21 = vrot.slane %v1673_v19, %v3755_v29 }
 0x1fc   : > { %v1681_v20 = vcombine.low %v1664_v17, %v1672_v18 }
 0x1fe   : > { %v1688_v23 = vrot.slane %v1681_v20, %v3755_v29 }
 0x200   : > { %v1689_v24 = vcombine.low %v1680_v21, %v1688_v23  ;;  %v1690_v26 = vcombine.high %v1680_v21, %v1688_v23 }
 0x202   : > { %1694 = vst [vmem:[#allocation3 + $0x20] sm:$0xff] %v1689_v24  ;;  %1698 = vst [vmem:[#allocation3 + $0x38] sm:$0xff] %v1690_v26 }
 0x203 PF: > { %v1699_v27 = vmul.f32 %v3736_v0, %v3736_v0  ;;  %v1700_v28 = vmul.f32 %v3738_v1, %v3738_v1  ;;  %v1755_v22 = vld [vmem:[#allocation9 + $0xf8] sm:$0xff]  ;;  %v1754_v30 = vld [vmem:[#allocation9 + $0xf0] sm:$0xff]  ;;  %v1753_v31 = vld [vmem:[#allocation9 + $0xe8] sm:$0xff]  ;;  %s4115_s27 = sld [smem:[#allocation39_spill]]  ;;  %vm3383_vm0 = vmmov 0   ;;  %vm2125_vm1 = vcmask 261120  }
 0x204   : > { %1788 = vmatprep.subr.mxu0 %v1755_v22  ;;  %v1752_v32 = vld [vmem:[#allocation9 + $0xe0] sm:$0xff]  ;;  %v1751_v34 = vld [vmem:[#allocation9 + $0xd8] sm:$0xff]  ;;  %v1750_v29 = vld [vmem:[#allocation9 + $0xd0] sm:$0xff]  ;;  %s4116_s0 = sld [smem:[#allocation24_spill]]  ;;  %s2574_s3 = sshll.u32 %s3740_s9, 4  ;;  %s2575_s3 = int_to_ptr.vmem [resolvable:$true] %s2574_s3 }
 0x205   : > { %v1701_v33 = vadd.f32 %v1700_v28, %v1699_v27  ;;  %1789 = vmatpush1.msra.mxu0 %v1754_v30  ;;  %v1749_v35 = vld [vmem:[#allocation9 + $0xc8] sm:$0xff]  ;;  %v1748_v36 = vld [vmem:[#allocation9 + $0xc0] sm:$0xff]  ;;  %v1747_v37 = vld [vmem:[#allocation9 + $0xb8] sm:$0xff]  ;;  %s4117_s30 = sld [smem:[#allocation25_spill]]  ;;  %s2558_s20 = scalar_lea.sflag [#allocation6], %s3704_s5 }
 0x206   : > { %1790 = vmatprep.subr.mxu0 %v1753_v31  ;;  %v1746_v38 = vld [vmem:[#allocation9 + $0xb0] sm:$0xff]  ;;  %v1745_v39 = vld [vmem:[#allocation9 + $0xa8] sm:$0xff]  ;;  %v1744_v40 = vld [vmem:[#allocation9 + $0xa0] sm:$0xff]  ;;  %s4118_s19 = sld [smem:[#allocation32_spill]]  ;;  %s3205_s2 = scalar_lea.vmem %s2575_s3, 256 }
 0x207   : > { %1702 = vadd.xlane.f32.xlu0 %v1701_v33  ;;  %1791 = vmatpush1.msra.mxu0 %v1752_v32  ;;  %v1743_v41 = vld [vmem:[#allocation9 + $0x98] sm:$0xff]  ;;  %v1742_v42 = vld [vmem:[#allocation9 + $0x90] sm:$0xff]  ;;  %v1741_v43 = vld [vmem:[#allocation9 + $0x88] sm:$0xff]  ;;  %s4119_s21 = sld [smem:[#allocation40_spill]]  ;;  %p3206_p0 = scmp.ne.s32.totalorder %s2575_s3, %s3205_s2 }
 0x208   : > { %1792 = vmatprep.subr.mxu0 %v1751_v34  ;;  %v1740_v44 = vld [vmem:[#allocation9 + $0x80] sm:$0xff]  ;;  %v1739_v45 = vld [vmem:[#allocation9 + $0x78] sm:$0xff]  ;;  %v1738_v46 = vld [vmem:[#allocation9 + $0x70] sm:$0xff]  ;;  %s3386_s17 = smov [#allocation15]  }
 0x209   : > { %1793 = vmatpush1.msra.mxu0 %v1750_v29  ;;  %v1737_v48 = vld [vmem:[#allocation9 + $0x68] sm:$0xff]  ;;  %v1736_v25 = vld [vmem:[#allocation9 + $0x60] sm:$0xff]  ;;  %v1735_v49 = vld [vmem:[#allocation9 + $0x58] sm:$0xff]  ;;  %v1712_v29 = vlaneseq }
 0x20a   : > { %1794 = vmatprep.subr.mxu0 %v1749_v35  ;;  %v1734_v50 = vld [vmem:[#allocation9 + $0x50] sm:$0xff]  ;;  %v1733_v51 = vld [vmem:[#allocation9 + $0x48] sm:$0xff]  ;;  %v1732_v47 = vld [vmem:[#allocation9 + $0x40] sm:$0xff]  ;;  %s2783_s11 = sshll.u32 %s4116_s0, 1 }
 0x20b   : > { %1795 = vmatpush1.msra.mxu0 %v1748_v36  ;;  %v1731_v52 = vld [vmem:[#allocation9 + $0x38] sm:$0xff]  ;;  %v1730_v53 = vld [vmem:[#allocation9 + $0x30] sm:$0xff]  ;;  %v1729_v54 = vld [vmem:[#allocation9 + $0x28] sm:$0xff]  ;;  %v1713_v35 = vshrl.u32 %v1712_v29, 7  ;;  %s2784_s1 = sshll.u32 %s4117_s30, 2 }
 0x20c   : > { %1796 = vmatprep.subr.mxu0 %v1747_v37  ;;  %v1728_v55 = vld [vmem:[#allocation9 + $0x20] sm:$0xff]  ;;  %v1727_v56 = vld [vmem:[#allocation9 + $0x18] sm:$0xff]  ;;  %v1726_v57 = vld [vmem:[#allocation9 + $0x10] sm:$0xff]  ;;  %s2570_s7 = sadd.s32 %s2784_s1, %s2783_s11  ;;  %p4120_p1 = scmp.ne.s32.totalorder %s4118_s19, 0 }
 0x20d   : > { %1797 = vmatpush1.msra.mxu0 %v1746_v38  ;;  %v1725_v58 = vld [vmem:[#allocation9 + $0x8] sm:$0xff]  ;;  %v1724_v59 = vld [vmem:[#allocation9] sm:$0xff]  ;;  %v1787_v60 = vld [vmem:[#allocation9 + $0x1f8] sm:$0xff]  ;;  %v1714_v36 = vsub.s32 0, %v1713_v35  ;;  %v1718_v37 = vsub.s32 1, %v1713_v35  ;;  %s2785_s23 = sshll.u32 %s2570_s7, 7 }
 0x20e   : > { %1798 = vmatprep.subr.mxu0 %v1745_v39  ;;  %v1786_v61 = vld [vmem:[#allocation9 + $0x1f0] sm:$0xff]  ;;  %v1785_v62 = vld [vmem:[#allocation9 + $0x1e8] sm:$0xff]  ;;  %v1784_v63 = vld [vmem:[#allocation9 + $0x1e0] sm:$0xff]  ;;  %s2572_s16 = scalar_lea.hbm %s4119_s21, %s2785_s23  ;;  %p3207_p6 = pnand %p3206_p0, %p4120_p1 }
 0x20f   : > { %1799 = vmatpush1.msra.mxu0 %v1744_v40  ;;  %v1783_v2 = vld [vmem:[#allocation9 + $0x1d8] sm:$0xff]  ;;  %v1782_v3 = vld [vmem:[#allocation9 + $0x1d0] sm:$0xff]  ;;  %v1781_v4 = vld [vmem:[#allocation9 + $0x1c8] sm:$0xff] }
 0x210   : > { %1800 = vmatprep.subr.mxu0 %v1743_v41  ;;  %v1780_v5 = vld [vmem:[#allocation9 + $0x1c0] sm:$0xff]  ;;  %v1779_v6 = vld [vmem:[#allocation9 + $0x1b8] sm:$0xff]  ;;  %v1778_v7 = vld [vmem:[#allocation9 + $0x1b0] sm:$0xff]  ;;  %p3208_p8 = pneg %p3207_p6 }
 0x211   : > { %1801 = vmatpush1.msra.mxu0 %v1742_v42  ;;  %v1777_v8 = vld [vmem:[#allocation9 + $0x1a8] sm:$0xff]  ;;  %v1776_v9 = vld [vmem:[#allocation9 + $0x1a0] sm:$0xff]  ;;  %v1775_v10 = vld [vmem:[#allocation9 + $0x198] sm:$0xff] }
 0x212   : > { %1802 = vmatprep.subr.mxu0 %v1741_v43  ;;  %v1774_v11 = vld [vmem:[#allocation9 + $0x190] sm:$0xff]  ;;  %v1773_v12 = vld [vmem:[#allocation9 + $0x188] sm:$0xff]  ;;  %v1772_v13 = vld [vmem:[#allocation9 + $0x180] sm:$0xff] }
 0x213   : > { %1803 = vmatpush1.msra.mxu0 %v1740_v44  ;;  %v1771_v14 = vld [vmem:[#allocation9 + $0x178] sm:$0xff]  ;;  %v1770_v15 = vld [vmem:[#allocation9 + $0x170] sm:$0xff]  ;;  %v1769_v16 = vld [vmem:[#allocation9 + $0x168] sm:$0xff] }
 0x214   : > { %1804 = vmatprep.subr.mxu0 %v1739_v45  ;;  %v1768_v17 = vld [vmem:[#allocation9 + $0x160] sm:$0xff]  ;;  %v1767_v18 = vld [vmem:[#allocation9 + $0x158] sm:$0xff]  ;;  %v1766_v19 = vld [vmem:[#allocation9 + $0x150] sm:$0xff] }
 0x215   : > { %1805 = vmatpush1.msra.mxu0 %v1738_v46  ;;  %v1765_v20 = vld [vmem:[#allocation9 + $0x148] sm:$0xff]  ;;  %v1764_v21 = vld [vmem:[#allocation9 + $0x140] sm:$0xff]  ;;  %v1763_v23 = vld [vmem:[#allocation9 + $0x138] sm:$0xff]  ;;  %v3382_v46 = vmov 0.0  }
 0x216   : > { %1806 = vmatprep.subr.mxu0 %v1737_v48  ;;  %v1762_v24 = vld [vmem:[#allocation9 + $0x130] sm:$0xff]  ;;  %v1761_v26 = vld [vmem:[#allocation9 + $0x128] sm:$0xff]  ;;  %v1760_v27 = vld [vmem:[#allocation9 + $0x120] sm:$0xff]  ;;  %2820 = vmatprep.subr.mxu1 %v3382_v46 }
 0x217   : > { %1807 = vmatpush1.msra.mxu0 %v1736_v25  ;;  %v1759_v28 = vld [vmem:[#allocation9 + $0x118] sm:$0xff]  ;;  %v1758_v22 = vld [vmem:[#allocation9 + $0x110] sm:$0xff]  ;;  %v1757_v30 = vld [vmem:[#allocation9 + $0x108] sm:$0xff]  ;;  %2828 = vmatprep.mubr.msk.f32.mxu1 %vm3383_vm0, %v3382_v46 }
 0x218   : > { %1808 = vmatprep.subr.mxu0 %v1735_v49  ;;  %v1756_v31 = vld [vmem:[#allocation9 + $0x100] sm:$0xff]  ;;  %v1978_v48 = vld [vmem:[#allocation2 + $0x10] sm:$0xff]  ;;  %v1982_v25 = vld [vmem:[#allocation2 + $0x38] sm:$0xff] }
 0x219   : > { %1809 = vmatpush1.msra.mxu0 %v1734_v50  ;;  %v1710_v38 = vld [vmem:[%s4115_s27] sm:$0x3]  ;;  %2821 = vmatpush3.xpose.msra.mxu1 %v1982_v25  ;;  %v1977_v49 = vld [vmem:[#allocation2 + $0x18] sm:$0xff]  ;;  %v1981_v50 = vld [vmem:[#allocation2 + $0x28] sm:$0xff] }
 0x21a   : > { %1810 = vmatprep.subr.mxu0 %v1733_v51  ;;  %v1715_v39 = vrot.slane %v1710_v38, %v1714_v36  ;;  %v1719_v40 = vrot.slane %v1710_v38, %v1718_v37  ;;  %2822 = vmatprep.subr.mxu1 %v3382_v46  ;;  %v1976_v51 = vld [vmem:[#allocation2] sm:$0xff] }
 0x21b   : > { %1811 = vmatpush1.msra.mxu0 %v1732_v47  ;;  %v1980_v47 = vld [vmem:[#allocation2 + $0x20] sm:$0xff] }
 0x21c   : > { %1812 = vmatprep.subr.mxu0 %v1731_v52  ;;  %v1975_v52 = vld [vmem:[#allocation2 + $0x30] sm:$0xff] }
 0x21d   : > { %1813 = vmatpush1.msra.mxu0 %v1730_v53  ;;  %2823 = vmatpush3.xpose.msra.mxu1 %v1981_v50  ;;  %v1979_v53 = vld [vmem:[#allocation2 + $0x8] sm:$0xff] }
 0x21e   : > { %1814 = vmatprep.subr.mxu0 %v1729_v54  ;;  %2824 = vmatprep.subr.mxu1 %v3382_v46  ;;  %v3384_v54 = vmov 1983009808  }
 0x21f   : > { %1815 = vmatpush1.msra.mxu0 %v1728_v55  ;;  %v1861_v55 = vunpack.c.l.s4 %v3384_v54  ;;  %v2154_v54 = vld [vmem:[#allocation3 + $0x30] sm:$0xff] }
 0x220   : > { %1816 = vmatprep.subr.mxu0 %v1727_v56 }
 0x221   : > { %1817 = vmatpush1.msra.mxu0 %v1726_v57  ;;  %2825 = vmatpush3.xpose.msra.mxu1 %v1980_v47  ;;  %v1862_v56 = vunpack.c.0.s8 %v1861_v55  ;;  %v3385_v57 = vmov 1934713408   ;;  %v2151_v47 = vld [vmem:[#allocation3 + $0x20] sm:$0xff]  ;;  %v2149_v55 = vld [vmem:[#allocation3 + $0x18] sm:$0xff] }
 0x222   : > { %1818 = vmatprep.subr.mxu0 %v1725_v58  ;;  %2826 = vmatprep.subr.mxu1 %v3382_v46  ;;  %v1892_v58 = vunpack.c.l.s4 %v3385_v57  ;;  %v2148_v57 = vld [vmem:[#allocation3] sm:$0xff] }
 0x223   : > { %1819 = vmatpush1.msra.mxu0 %v1724_v59  ;;  %v3906_v59 = vsub.s32 %v1862_v56, %v1713_v35  ;;  %v2153_v56 = vld [vmem:[#allocation3 + $0x8] sm:$0xff] }
 0x224   : > { %1820 = vmatprep.subr.mxu0 %v1787_v60  ;;  %v1893_v60 = vunpack.c.0.s8 %v1892_v58  ;;  %v2152_v58 = vld [vmem:[#allocation3 + $0x28] sm:$0xff] }
 0x225   : > { %1821 = vmatpush2.msra.mxu0 %v1786_v61  ;;  %2827 = vmatpush3.xpose.msra.mxu1 %v1979_v53  ;;  %v2150_v53 = vld [vmem:[#allocation3 + $0x10] sm:$0xff] }
 0x226   : > { %1822 = vmatprep.subr.mxu0 %v1785_v62  ;;  %2842 = vmatprep.subr.mxu1 %v3382_v46 }
 0x227   : > { %1823 = vmatpush2.msra.mxu0 %v1784_v63 }
 0x228   : > { %1824 = vmatprep.subr.mxu0 %v1783_v2  ;;  %v3909_v2 = vsub.s32 %v1893_v60, %v1713_v35  ;;  %v2449_v60 = vld [vmem:[#allocation12 + $0xf8] sm:$0xff] }
 0x229   : > { %1825 = vmatpush2.msra.mxu0 %v1782_v3 }
 0x22a   : > { %1826 = vmatprep.subr.mxu0 %v1781_v4 }
 0x22b   : > { %1827 = vmatpush2.msra.mxu0 %v1780_v5 }
 0x22c   : > { %1828 = vmatprep.subr.mxu0 %v1779_v6 }
 0x22d   : > { %1829 = vmatpush2.msra.mxu0 %v1778_v7 }
 0x22e   : > { %1830 = vmatprep.subr.mxu0 %v1777_v8 }
 0x22f   : > { %1831 = vmatpush2.msra.mxu0 %v1776_v9 }
 0x230   : > { %1832 = vmatprep.subr.mxu0 %v1775_v10 }
 0x231   : > { %1833 = vmatpush2.msra.mxu0 %v1774_v11 }
 0x232   : > { %1834 = vmatprep.subr.mxu0 %v1773_v12 }
 0x233   : > { %1835 = vmatpush2.msra.mxu0 %v1772_v13 }
 0x234   : > { %1836 = vmatprep.subr.mxu0 %v1771_v14 }
 0x235   : > { %1837 = vmatpush2.msra.mxu0 %v1770_v15 }
 0x236   : > { %1838 = vmatprep.subr.mxu0 %v1769_v16 }
 0x237   : > { %1839 = vmatpush2.msra.mxu0 %v1768_v17 }
 0x238   : > { %1840 = vmatprep.subr.mxu0 %v1767_v18 }
 0x239   : > { %1841 = vmatpush2.msra.mxu0 %v1766_v19 }
 0x23a   : > { %1842 = vmatprep.subr.mxu0 %v1765_v20 }
 0x23b   : > { %1843 = vmatpush2.msra.mxu0 %v1764_v21 }
 0x23c   : > { %1844 = vmatprep.subr.mxu0 %v1763_v23 }
 0x23d   : > { %1845 = vmatpush2.msra.mxu0 %v1762_v24 }
 0x23e   : > { %1846 = vmatprep.subr.mxu0 %v1761_v26 }
 0x23f   : > { %1847 = vmatpush2.msra.mxu0 %v1760_v27 }
 0x240   : > { %1848 = vmatprep.subr.mxu0 %v1759_v28 }
 0x241   : > { %1849 = vmatpush2.msra.mxu0 %v1758_v22 }
 0x242   : > { %1850 = vmatprep.subr.mxu0 %v1757_v30 }
 0x243   : > { %1851 = vmatpush2.msra.mxu0 %v1756_v31 }
 0x244   : > { %2809 = vmatprep.subr.mxu0 %v3382_v46 }
 0x290   : > { %v1703_v32 = vpop.xlane.xlu0 %1702 }
 0x291   : > { %v1705_v33 = vmul.f32 0.00390625, %v1703_v32  ;;  %v1983_v32 = vld [vmem:[%s394_s22] sm:$0xff] }
 0x293   : > { %v1706_v34 = vadd.f32 1e-06, %v1705_v33  ;;  %v1984_v33 = vld [vmem:[%s394_s22 + $0x8] sm:$0xff]  ;;  %s3209_s22 = sshll.u32 %s3386_s17, 4  ;;  %s3210_s22 = int_to_ptr.vmem [resolvable:$false] %s3209_s22 }
 0x294   : > { %s3211_s15 = scalar_lea.vmem %s3210_s22, 512  ;;  %p3212_p13 = scmp.lt.s32.totalorder %s2575_s3, %s3210_s22 }
 0x295   : > { %3033 = vrsqrt.f32 %v1706_v34  ;;  %p3213_p2 = scmp.lt.s32.totalorder %s3211_s15, %s3205_s2 }
 0x297   : > { %p3214_p10 = por %p3213_p2, %p3212_p13 }
 0x299   : > { %p3215_p3 = pnand %p3214_p10, %p3208_p8 }
 0x2a2   : > { %v3034_v41 = vpop.eup %3033 }
 0x2a3   : > { %v1709_v42 = vmul.f32 %v3034_v41, %v3738_v1  ;;  %v1708_v43 = vmul.f32 %v3034_v41, %v3736_v0 }
 0x2a5   : > { %v1723_v44 = vmul.f32 %v1719_v40, %v1709_v42  ;;  %v1722_v45 = vmul.f32 %v1715_v39, %v1708_v43 }
 0x2a7   : > { %1852 = vmatprep.mubr.f32.mxu0 %v1723_v44 }
 0x2a8   : > { %1853 = vmatmul.mubr.f32.vlgmr.msra.gmra.mxu0 %v1722_v45 }
 0x2a9   : > { %2810 = vmatpush3.xpose.msra.mxu0 %v1978_v48  ;;  %2817 = vmatprep.mubr.msk.f32.mxu0 %vm3383_vm0, %v3382_v46 }
 0x2aa   : > { %2811 = vmatprep.subr.mxu0 %v3382_v46 }
 0x2ad   : > { %2812 = vmatpush3.xpose.msra.mxu0 %v1977_v49 }
 0x2ae   : > { %2813 = vmatprep.subr.mxu0 %v3382_v46 }
 0x2b1   : > { %2814 = vmatpush3.xpose.msra.mxu0 %v1976_v51 }
 0x2b2   : > { %2815 = vmatprep.subr.mxu0 %v3382_v46 }
 0x2b5   : > { %2816 = vmatpush3.xpose.msra.mxu0 %v1975_v52  ;;  %v2155_v52 = vld [vmem:[#allocation3 + $0x38] sm:$0xff] }
 0x2b6   : > { %2831 = vmatprep.subr.mxu0 %v3382_v46 }
 0x368   : > { %v1854_v61 = vpop.f32.mrf.mxu0 }
 0x369   : > { %v1859_v62 = vcombine.high %v1854_v61, %v3382_v46  ;;  %v1866_v3 = vrot.slane %v1854_v61, %v3906_v59 }
 0x36a   : > { %v1856_v63 = vpop.f32.mrf.mxu0 }
 0x36b   : > { %v1874_v4 = vcombine.high %v1856_v63, %v3382_v46  ;;  %v1881_v5 = vrot.slane %v1856_v63, %v3906_v59  ;;  %v1873_v6 = vrot.slane %v1859_v62, %v3906_v59 }
 0x36d   : > { %v1888_v7 = vrot.slane %v1874_v4, %v3906_v59  ;;  %v1889_v8 = vcombine.low %v1866_v3, %v1881_v5  ;;  %v1890_v9 = vcombine.high %v1866_v3, %v1881_v5  ;;  %v2448_v5 = vld [vmem:[#allocation12 + $0xf0] sm:$0xff] }
 0x36f   : > { %v1897_v10 = vrot.slane %v1889_v8, %v3909_v2  ;;  %v1904_v11 = vrot.slane %v1890_v9, %v3909_v2  ;;  %v1905_v12 = vcombine.low %v1873_v6, %v1888_v7  ;;  %v1906_v13 = vcombine.high %v1873_v6, %v1888_v7  ;;  %v2447_v7 = vld [vmem:[#allocation12 + $0xe8] sm:$0xff]  ;;  %v2446_v8 = vld [vmem:[#allocation12 + $0xe0] sm:$0xff]  ;;  %v2445_v9 = vld [vmem:[#allocation12 + $0xd8] sm:$0xff] }
 0x371   : > { %v1913_v14 = vrot.slane %v1905_v12, %v3909_v2  ;;  %v1920_v15 = vrot.slane %v1906_v13, %v3909_v2  ;;  %v1925_v16 = vcombine.low %v1897_v10, %v1904_v11  ;;  %v2776_v17 = vcombine.high %v1897_v10, %v1904_v11  ;;  %v2444_v10 = vld [vmem:[#allocation12 + $0xd0] sm:$0xff]  ;;  %v2443_v11 = vld [vmem:[#allocation12 + $0xc8] sm:$0xff]  ;;  %v2442_v12 = vld [vmem:[#allocation12 + $0xc0] sm:$0xff] }
 0x372   : > { %v2441_v13 = vld [vmem:[#allocation12 + $0xb8] sm:$0xff] }
 0x373   : > { %v1932_v18 = vrot.slane %v1925_v16, %v3906_v59  ;;  %v1940_v19 = vrot.slane %v2776_v17, %v3906_v59  ;;  %v1941_v20 = vcombine.low %v1913_v14, %v1920_v15  ;;  %v2777_v21 = vcombine.high %v1913_v14, %v1920_v15  ;;  %v2440_v14 = vld [vmem:[#allocation12 + $0xb0] sm:$0xff]  ;;  %v2439_v15 = vld [vmem:[#allocation12 + $0xa8] sm:$0xff]  ;;  %v2438_v16 = vld [vmem:[#allocation12 + $0xa0] sm:$0xff] }
 0x374   : > { %v2437_v17 = vld [vmem:[#allocation12 + $0x98] sm:$0xff] }
 0x375   : > { %v1948_v23 = vrot.slane %v1941_v20, %v3906_v59  ;;  %v1956_v24 = vrot.slane %v2777_v21, %v3906_v59  ;;  %v1957_v26 = vcombine.low %v1932_v18, %v1940_v19  ;;  %v2436_v18 = vld [vmem:[#allocation12 + $0x90] sm:$0xff]  ;;  %v2435_v19 = vld [vmem:[#allocation12 + $0x88] sm:$0xff]  ;;  %v2434_v20 = vld [vmem:[#allocation12 + $0x80] sm:$0xff] }
 0x376   : > { %v2433_v21 = vld [vmem:[#allocation12 + $0x78] sm:$0xff] }
 0x377   : > { %v1965_v27 = vcombine.low %v1948_v23, %v1956_v24  ;;  %v1964_v28 = vrot.slane %v1957_v26, %v3909_v2  ;;  %v2432_v23 = vld [vmem:[#allocation12 + $0x70] sm:$0xff]  ;;  %v2431_v24 = vld [vmem:[#allocation12 + $0x68] sm:$0xff]  ;;  %v2430_v26 = vld [vmem:[#allocation12 + $0x60] sm:$0xff] }
 0x379   : > { %v1972_v22 = vrot.slane %v1965_v27, %v3909_v2  ;;  %v2429_v27 = vld [vmem:[#allocation12 + $0x58] sm:$0xff] }
 0x37b   : > { %v1973_v30 = vcombine.low %v1964_v28, %v1972_v22  ;;  %v1974_v31 = vcombine.high %v1964_v28, %v1972_v22  ;;  %v2428_v28 = vld [vmem:[#allocation12 + $0x50] sm:$0xff]  ;;  %v2427_v22 = vld [vmem:[#allocation12 + $0x48] sm:$0xff] }
 0x37d   : > { %2818 = vmatmul.mubr.f32.vlgmr.msra.gmra.mxu0 %v1973_v30  ;;  %2829 = vmatmul.mubr.f32.vlgmr.msra.gmra.mxu1 %v1974_v31  ;;  %v2426_v30 = vld [vmem:[#allocation12 + $0x40] sm:$0xff]  ;;  %v2425_v31 = vld [vmem:[#allocation12 + $0x38] sm:$0xff] }
 0x37e   : > { %2839 = vmatprep.mubr.msk.f32.mxu0 %vm3383_vm0, %v3382_v46  ;;  %2850 = vmatprep.mubr.msk.f32.mxu1 %vm3383_vm0, %v3382_v46 }
 0x37f   : > { %2832 = vmatpush3.msra.mxu0 %v2151_v47  ;;  %2843 = vmatpush3.msra.mxu1 %v2155_v52  ;;  %v2468_v47 = vld [vmem:[#allocation12 + $0x190] sm:$0xff]  ;;  %v2467_v52 = vld [vmem:[#allocation12 + $0x188] sm:$0xff] }
 0x380   : > { %2833 = vmatprep.subr.mxu0 %v3382_v46  ;;  %2844 = vmatprep.subr.mxu1 %v3382_v46 }
 0x381   : > { %2834 = vmatpush3.msra.mxu0 %v2150_v53  ;;  %2845 = vmatpush3.msra.mxu1 %v2154_v54  ;;  %v2466_v53 = vld [vmem:[#allocation12 + $0x180] sm:$0xff]  ;;  %v2465_v54 = vld [vmem:[#allocation12 + $0x178] sm:$0xff] }
 0x382   : > { %2835 = vmatprep.subr.mxu0 %v3382_v46  ;;  %2846 = vmatprep.subr.mxu1 %v3382_v46 }
 0x383   : > { %2836 = vmatpush3.msra.mxu0 %v2149_v55  ;;  %2847 = vmatpush3.msra.mxu1 %v2153_v56  ;;  %v2464_v55 = vld [vmem:[#allocation12 + $0x170] sm:$0xff]  ;;  %v2463_v56 = vld [vmem:[#allocation12 + $0x168] sm:$0xff] }
 0x384   : > { %2837 = vmatprep.subr.mxu0 %v3382_v46  ;;  %2848 = vmatprep.subr.mxu1 %v3382_v46 }
 0x385   : > { %2838 = vmatpush3.msra.mxu0 %v2148_v57  ;;  %2849 = vmatpush3.msra.mxu1 %v2152_v58  ;;  %v2462_v57 = vld [vmem:[#allocation12 + $0x160] sm:$0xff]  ;;  %v2461_v58 = vld [vmem:[#allocation12 + $0x158] sm:$0xff] }
 0x386   : > { %2482 = vmatprep.subr.mxu1 %v2449_v60  ;;  %v2460_v60 = vld [vmem:[#allocation12 + $0x150] sm:$0xff] }
 0x43d   : > { %v2051_v34 = vpop.f32.mrf.mxu0  ;;  %v2121_v29 = vpop.f32.mrf.mxu1 }
 0x43e   : > { %v2052_v35 = vadd.f32 %v2051_v34, %v1983_v32  ;;  %v2122_v36 = vadd.f32 %v2121_v29, %v1984_v33  ;;  %v2424_v32 = vld [vmem:[#allocation12 + $0x30] sm:$0xff]  ;;  %v2423_v33 = vld [vmem:[#allocation12 + $0x28] sm:$0xff]  ;;  %v2422_v34 = vld [vmem:[#allocation12 + $0x20] sm:$0xff] }
 0x43f   : > { %v2819_v37 = vpop.f32.mrf.mxu0  ;;  %v2830_v38 = vpop.f32.mrf.mxu1  ;;  %v2421_v29 = vld [vmem:[#allocation12 + $0x18] sm:$0xff] }
 0x440   : > { %v2129_v39 = vsel %vm2125_vm1, %v2122_v36, -inf  ;;  %v2126_v40 = vsel %vm2125_vm1, %v2052_v35, -inf  ;;  %v2418_v37 = vld [vmem:[#allocation12] sm:$0xff]  ;;  %v2481_v38 = vld [vmem:[#allocation12 + $0x1f8] sm:$0xff] }
 0x441   : > { %2130 = vmax.xlane.f32.xlu1 %v2129_v39  ;;  %2127 = vmax.xlane.f32.xlu0 %v2126_v40  ;;  %v2480_v39 = vld [vmem:[#allocation12 + $0x1f0] sm:$0xff]  ;;  %v2479_v40 = vld [vmem:[#allocation12 + $0x1e8] sm:$0xff] }
 0x4ca   : > { %v2131_v41 = vpop.xlane.xlu1 %2130  ;;  %v2128_v42 = vpop.xlane.xlu0 %2127 }
 0x4cb   : > { %v2133_v43 = vsub.f32 %v2122_v36, %v2131_v41  ;;  %v2132_v44 = vsub.f32 %v2052_v35, %v2128_v42  ;;  %v2420_v35 = vld [vmem:[#allocation12 + $0x10] sm:$0xff]  ;;  %v2419_v36 = vld [vmem:[#allocation12 + $0x8] sm:$0xff]  ;;  %v2478_v41 = vld [vmem:[#allocation12 + $0x1e0] sm:$0xff] }
 0x4cc   : > { %v2477_v42 = vld [vmem:[#allocation12 + $0x1d8] sm:$0xff] }
 0x4cd   : > { %v2136_v45 = vmul.f32 1.442695, %v2133_v43  ;;  %v2134_v48 = vmul.f32 1.442695, %v2132_v44  ;;  %v2476_v43 = vld [vmem:[#allocation12 + $0x1d0] sm:$0xff]  ;;  %v2475_v44 = vld [vmem:[#allocation12 + $0x1c8] sm:$0xff] }
 0x4cf   : > { %3035 = vpow2.f32 %v2136_v45  ;;  %v2474_v45 = vld [vmem:[#allocation12 + $0x1c0] sm:$0xff] }
 0x4d0   : > { %3037 = vpow2.f32 %v2134_v48  ;;  %v2473_v48 = vld [vmem:[#allocation12 + $0x1b8] sm:$0xff] }
 0x4dc   : > { %v3036_v25 = vpop.eup %3035 }
 0x4dd   : > { %v3038_v49 = vpop.eup %3037  ;;  %v2141_v50 = vsel %vm2125_vm1, %v3036_v25, 0.0 }
 0x4de   : > { %2142 = vadd.xlane.f32.xlu0 %v2141_v50  ;;  %v2138_v51 = vsel %vm2125_vm1, %v3038_v49, 0.0  ;;  %v2470_v50 = vld [vmem:[#allocation12 + $0x1a0] sm:$0xff] }
 0x4df   : > { %2139 = vadd.xlane.f32.xlu1 %v2138_v51  ;;  %v2469_v51 = vld [vmem:[#allocation12 + $0x198] sm:$0xff] }
 0x567   : > { %v2143_v61 = vpop.xlane.xlu0 %2142 }
 0x568   : > { %v2140_v62 = vpop.xlane.xlu1 %2139  ;;  %3039 = vrcp.f32 %v2143_v61  ;;  %v2459_v61 = vld [vmem:[#allocation12 + $0x148] sm:$0xff] }
 0x569   : > { %3041 = vrcp.f32 %v2140_v62  ;;  %v2458_v62 = vld [vmem:[#allocation12 + $0x140] sm:$0xff] }
 0x575   : > { %v3040_v63 = vpop.eup %3039 }
 0x576   : > { %v3042_v3 = vpop.eup %3041  ;;  %v2147_v4 = vmul.f32 %v3040_v63, %v3036_v25  ;;  %v2472_v25 = vld [vmem:[#allocation12 + $0x1b0] sm:$0xff]  ;;  %v2457_v63 = vld [vmem:[#allocation12 + $0x138] sm:$0xff] }
 0x577   : > { %v2145_v6 = vmul.f32 %v3042_v3, %v3038_v49  ;;  %v2471_v49 = vld [vmem:[#allocation12 + $0x1a8] sm:$0xff]  ;;  %v2456_v3 = vld [vmem:[#allocation12 + $0x130] sm:$0xff] }
 0x578   : > { %2851 = vmatmul.mubr.msk.f32.vlgmr.msra.gmra.mxu1 %vm2125_vm1, %v2147_v4  ;;  %v2455_v4 = vld [vmem:[#allocation12 + $0x128] sm:$0xff] }
 0x579   : > { %2840 = vmatmul.mubr.msk.f32.vlgmr.msra.gmra.mxu0 %vm2125_vm1, %v2145_v6  ;;  %2483 = vmatpush1.msra.mxu1 %v2448_v5  ;;  %v2454_v5 = vld [vmem:[#allocation12 + $0x120] sm:$0xff]  ;;  %v2453_v6 = vld [vmem:[#allocation12 + $0x118] sm:$0xff] }
 0x57a   : > { %2484 = vmatprep.subr.mxu1 %v2447_v7  ;;  %v2452_v7 = vld [vmem:[#allocation12 + $0x110] sm:$0xff] }
 0x57b   : > { %2485 = vmatpush1.msra.mxu1 %v2446_v8  ;;  %v2451_v8 = vld [vmem:[#allocation12 + $0x108] sm:$0xff] }
 0x57c   : > { %2486 = vmatprep.subr.mxu1 %v2445_v9  ;;  %v2450_v9 = vld [vmem:[#allocation12 + $0x100] sm:$0xff] }
 0x57d   : > { %2487 = vmatpush1.msra.mxu1 %v2444_v10 }
 0x57e   : > { %2488 = vmatprep.subr.mxu1 %v2443_v11 }
 0x57f   : > { %2489 = vmatpush1.msra.mxu1 %v2442_v12 }
 0x580   : > { %2490 = vmatprep.subr.mxu1 %v2441_v13 }
 0x581   : > { %2491 = vmatpush1.msra.mxu1 %v2440_v14 }
 0x582   : > { %2492 = vmatprep.subr.mxu1 %v2439_v15 }
 0x583   : > { %2493 = vmatpush1.msra.mxu1 %v2438_v16 }
 0x584   : > { %2494 = vmatprep.subr.mxu1 %v2437_v17 }
 0x585   : > { %2495 = vmatpush1.msra.mxu1 %v2436_v18 }
 0x586   : > { %2496 = vmatprep.subr.mxu1 %v2435_v19 }
 0x587   : > { %2497 = vmatpush1.msra.mxu1 %v2434_v20 }
 0x588   : > { %2498 = vmatprep.subr.mxu1 %v2433_v21 }
 0x589   : > { %2499 = vmatpush1.msra.mxu1 %v2432_v23 }
 0x58a   : > { %2500 = vmatprep.subr.mxu1 %v2431_v24 }
 0x58b   : > { %2501 = vmatpush1.msra.mxu1 %v2430_v26 }
 0x58c   : > { %2502 = vmatprep.subr.mxu1 %v2429_v27 }
 0x58d   : > { %2503 = vmatpush1.msra.mxu1 %v2428_v28 }
 0x58e   : > { %2504 = vmatprep.subr.mxu1 %v2427_v22 }
 0x58f   : > { %2505 = vmatpush1.msra.mxu1 %v2426_v30 }
 0x590   : > { %2506 = vmatprep.subr.mxu1 %v2425_v31 }
 0x591   : > { %2507 = vmatpush1.msra.mxu1 %v2424_v32 }
 0x592   : > { %2508 = vmatprep.subr.mxu1 %v2423_v33 }
 0x593   : > { %2509 = vmatpush1.msra.mxu1 %v2422_v34 }
 0x594   : > { %2510 = vmatprep.subr.mxu1 %v2421_v29 }
 0x595   : > { %2511 = vmatpush1.msra.mxu1 %v2420_v35 }
 0x596   : > { %2512 = vmatprep.subr.mxu1 %v2419_v36 }
 0x597   : > { %2513 = vmatpush1.msra.mxu1 %v2418_v37 }
 0x598   : > { %2514 = vmatprep.subr.mxu1 %v2481_v38 }
 0x599   : > { %2515 = vmatpush2.msra.mxu1 %v2480_v39 }
 0x59a   : > { %2516 = vmatprep.subr.mxu1 %v2479_v40 }
 0x59b   : > { %2517 = vmatpush2.msra.mxu1 %v2478_v41 }
 0x59c   : > { %2518 = vmatprep.subr.mxu1 %v2477_v42 }
 0x59d   : > { %2519 = vmatpush2.msra.mxu1 %v2476_v43 }
 0x59e   : > { %2520 = vmatprep.subr.mxu1 %v2475_v44 }
 0x59f   : > { %2521 = vmatpush2.msra.mxu1 %v2474_v45 }
 0x5a0   : > { %2522 = vmatprep.subr.mxu1 %v2473_v48 }
 0x5a1   : > { %2523 = vmatpush2.msra.mxu1 %v2472_v25 }
 0x5a2   : > { %2524 = vmatprep.subr.mxu1 %v2471_v49 }
 0x5a3   : > { %2525 = vmatpush2.msra.mxu1 %v2470_v50 }
 0x5a4   : > { %2526 = vmatprep.subr.mxu1 %v2469_v51 }
 0x5a5   : > { %2527 = vmatpush2.msra.mxu1 %v2468_v47 }
 0x5a6   : > { %2528 = vmatprep.subr.mxu1 %v2467_v52 }
 0x5a7   : > { %2529 = vmatpush2.msra.mxu1 %v2466_v53 }
 0x5a8   : > { %2530 = vmatprep.subr.mxu1 %v2465_v54 }
 0x5a9   : > { %2531 = vmatpush2.msra.mxu1 %v2464_v55 }
 0x5aa   : > { %2532 = vmatprep.subr.mxu1 %v2463_v56 }
 0x5ab   : > { %2533 = vmatpush2.msra.mxu1 %v2462_v57 }
 0x5ac   : > { %2534 = vmatprep.subr.mxu1 %v2461_v58 }
 0x5ad   : > { %2535 = vmatpush2.msra.mxu1 %v2460_v60 }
 0x5ae   : > { %2536 = vmatprep.subr.mxu1 %v2459_v61 }
 0x5af   : > { %2537 = vmatpush2.msra.mxu1 %v2458_v62 }
 0x5b0   : > { %2538 = vmatprep.subr.mxu1 %v2457_v63 }
 0x5b1   : > { %2539 = vmatpush2.msra.mxu1 %v2456_v3 }
 0x5b2   : > { %2540 = vmatprep.subr.mxu1 %v2455_v4 }
 0x5b3   : > { %2541 = vmatpush2.msra.mxu1 %v2454_v5 }
 0x5b4   : > { %2542 = vmatprep.subr.mxu1 %v2453_v6 }
 0x5b5   : > { %2543 = vmatpush2.msra.mxu1 %v2452_v7 }
 0x5b6   : > { %2544 = vmatprep.subr.mxu1 %v2451_v8 }
 0x5b7   : > { %2545 = vmatpush2.msra.mxu1 %v2450_v9 }
 0x638   : > { %v2298_v10 = vpop.f32.mrf.mxu1 }
 0x639   : > { %v2225_v11 = vpop.f32.mrf.mxu0  ;;  %v2317_v12 = vcombine.high %v2298_v10, %v3382_v46  ;;  %v2324_v13 = vrot.slane %v2298_v10, %v3906_v59 }
 0x63a   : > { %v2302_v14 = vcombine.high %v2225_v11, %v3382_v46  ;;  %v2309_v15 = vrot.slane %v2225_v11, %v3906_v59  ;;  %v2852_v16 = vpop.f32.mrf.mxu1 }
 0x63b   : > { %v2331_v17 = vrot.slane %v2317_v12, %v3906_v59  ;;  %v2841_v18 = vpop.f32.mrf.mxu0 }
 0x63c   : > { %v2316_v19 = vrot.slane %v2302_v14, %v3906_v59  ;;  %v2332_v20 = vcombine.low %v2309_v15, %v2324_v13  ;;  %v2333_v21 = vcombine.high %v2309_v15, %v2324_v13 }
 0x63e   : > { %v2340_v23 = vrot.slane %v2332_v20, %v3909_v2  ;;  %v2347_v24 = vrot.slane %v2333_v21, %v3909_v2  ;;  %v2348_v26 = vcombine.low %v2316_v19, %v2331_v17  ;;  %v2349_v27 = vcombine.high %v2316_v19, %v2331_v17 }
 0x640   : > { %v2356_v28 = vrot.slane %v2348_v26, %v3909_v2  ;;  %v2363_v46 = vrot.slane %v2349_v27, %v3909_v2  ;;  %v2368_v22 = vcombine.low %v2340_v23, %v2347_v24  ;;  %v2780_v30 = vcombine.high %v2340_v23, %v2347_v24 }
 0x642   : > { %v2375_v31 = vrot.slane %v2368_v22, %v3906_v59  ;;  %v2383_v32 = vrot.slane %v2780_v30, %v3906_v59  ;;  %v2384_v33 = vcombine.low %v2356_v28, %v2363_v46  ;;  %v2781_v34 = vcombine.high %v2356_v28, %v2363_v46 }
 0x644   : > { %v2391_v29 = vrot.slane %v2384_v33, %v3906_v59  ;;  %v2399_v35 = vrot.slane %v2781_v34, %v3906_v59  ;;  %v2400_v36 = vcombine.low %v2375_v31, %v2383_v32 }
 0x646   : > { %v2408_v37 = vcombine.low %v2391_v29, %v2399_v35  ;;  %v2407_v38 = vrot.slane %v2400_v36, %v3909_v2 }
 0x648   : > { %v2415_v39 = vrot.slane %v2408_v37, %v3909_v2 }
 0x64a   : > { %v2417_v40 = vcombine.high %v2407_v38, %v2415_v39  ;;  %v2416_v41 = vcombine.low %v2407_v38, %v2415_v39 }
 0x64c   : > { %2546 = vmatprep.mubr.f32.mxu1 %v2417_v40 }
 0x64d   : > { %2547 = vmatmul.mubr.f32.vlgmr.msra.gmra.mxu1 %v2416_v41 }
 0x70d   : > { %v2548_v42 = vpop.f32.mrf.mxu1 }
 0x70e   : > { %v2553_v59 = vadd.f32 %v2548_v42, %v3736_v0 }
 0x70f   : > { %v2550_v43 = vpop.f32.mrf.mxu1 }
 0x710   : > { %2555 = vst [vmem:[%s3740_s9] sm:$0xff] %v2553_v59  ;;  %v2554_v44 = vadd.f32 %v2550_v43, %v3738_v1 }
 0x712   : > { %2556 = vst [vmem:[%s3740_s9 + $0x8] sm:$0xff] %v2554_v44 }
 0x713   : > { %3218 = shalt.err (!%p3215_p3)
}
 0x714   : > { %s3219_s18 = scalar_lea.hbm %s2572_s16, 256  ;;  %s3223_s4 = scalar_lea.hbm %s4119_s21, 1024 }
 0x715   : > { %p3220_p4 = scmp.ne.s32.totalorder %s2572_s16, %s3219_s18  ;;  %p3224_p5 = scmp.lt.s32.totalorder %s2572_s16, %s4119_s21 }
 0x716   : > { %p3225_p7 = scmp.lt.s32.totalorder %s3223_s4, %s3219_s18 }
 0x717   : > { %p3221_p12 = pnand %p3220_p4, %p4120_p1 }
 0x718   : > { %p3226_p9 = por %p3225_p7, %p3224_p5 }
 0x719   : > { %p3222_p11 = pneg %p3221_p12 }
 0x71b   : > { %p3227_p0 = pnand %p3226_p9, %p3222_p11 }
 0x71d   : > { %3230 = shalt.err (!%p3227_p0)
}
 0x71e   : > { %2871 = dma.vmem_to_hbm [thread:$0]  (%p4120_p1), %s2575_s3, 256, %s2572_s16, %s2558_s20  }
 0x71f PF: > { %s4121_s30 = sld [smem:[#allocation22_spill]]  ;;  %p2904_p6 = scmp.ge.s32.totalorder %s3365_s14, 2 }
 0x720   : > { %s4122_s11 = sld [smem:[#allocation33_spill]] }
 0x725   : > { %s2586_s1 = sand.u32 1, %s4121_s30  }
 0x726   : > { %p4123_p8 = scmp.ne.s32.totalorder %s4122_s11, 0  ;;  %s2587_s7 = scalar_lea.sflag [#allocation6], %s2586_s1 }
 0x728   : > { %p2894_p13 = pnand %p2904_p6, %p4123_p8 }
 0x72a   : > { %p2895_p2 = pneg %p2894_p13 }
 0x72c   : > { %3308 = dma.done.wait (%p2895_p2), %s2587_s7, 256  }
 0x72d   : > { %3310 = vsyncadd (%p2895_p2), %s2587_s7, 4294967040  ;;  %s30_s14 = sadd.s32 1, %s3365_s14   ;;  %s4125_s19 = sld [smem:[#allocation31_spill]] }
 0x72e   : > { %p3990_p10 = scmp.ge.s32.totalorder %s30_s14, 6   ;;  %s4126_s3 = sld [smem:[#allocation29_spill]] }
 0x72f   : > { %s4127_s10 = sld [smem:[#allocation23_spill]]  ;;  %s4131_s24 = smov %s3317_s25 }
 0x730   : > { %s4128_s9 = sld [smem:[#allocation30_spill]]  ;;  %s4132_s25 = smov %s3321_s26 }
 0x731   : > { %s4129_s16 = sld [smem:[#allocation27_spill]]  ;;  %s4134_s27 = smov %s3329_s28 }
 0x732   : > { %s4130_s20 = sld [smem:[#allocation28_spill]]  ;;  %s4135_s28 = smov %s3333_s29 }
 0x733   : > { %s4133_s26 = smov %s4125_s19  ;;  %s4137_s30 = smov %s3341_s8 }
 0x734   : > { %s4136_s29 = smov %s4126_s3  ;;  %s4140_s11 = smov %s3361_s13 }
 0x735   : > { %s4138_s8 = smov %s4127_s10  ;;  %s4139_s10 = smov %s3357_s12 }
 0x736   :  { %29 = sbr.rel (!%p3990_p10) target bundleno = 23 (0x17), region = 135 }
 0x737   : > { %s4141_s12 = smov %s4129_s16 }
 0x738   : > { %s4142_s13 = smov %s4130_s20 }
 0x73b   :  { %2592 = vsyncpa [#allocation5], 1 }
 0x73c   :  { %2594 = vsyncpa [#allocation5 + $0x1], 1 }
 0x73d   :  { %2595 = vsyncpa [#allocation8], 1 }
 0x73e   :  { %2597 = vsyncpa [#allocation8 + $0x1], 1 }
 0x73f   :  { %2598 = vsyncpa [#allocation11], 1 }
 0x740   :  { %2599 = vsyncpa [#allocation14], 1 }
 0x741   :  { %2601 = vsyncpa [#allocation14 + $0x1], 1 }
 0x742   :  { %2602 = vsyncpa [#allocation6], 1 }
 0x743   :  { %2604 = vsyncpa [#allocation6 + $0x1], 1 }

</bundles_post_ra>
